<compile_context>
chip_gen: v7x
topology: tpu7x:2x2x1
jax: 0.10.0
libtpu: 0.0.40
codegen_flags: <defaults>
</compile_context>

<pallas_src>
import math
import functools

import jax
import jax.numpy as jnp
from jax.experimental import pallas as pl
from jax.experimental.pallas import tpu as pltpu


# ----------------------------- in-kernel helpers -----------------------------

_SQRT_2_OVER_PI = 0.7978845608028654


def _gelu(x):
    # BERT4Rec GELU (tanh approximation), f32 on the VPU/EUP.
    return 0.5 * x * (1.0 + jnp.tanh(_SQRT_2_OVER_PI * (x + 0.044715 * (x * x * x))))


def _bert4rec_layernorm(x, g, b, eps):
    # a_2 * (x - mean) / (std + eps) + b_2 with unbiased std (PyTorch Tensor.std default).
    h = x.shape[-1]
    mean = jnp.mean(x, axis=-1, keepdims=True)
    diff = x - mean
    var = jnp.sum(diff * diff, axis=-1, keepdims=True) * (1.0 / (h - 1))
    inv = pl.reciprocal(jnp.sqrt(var) + eps, approx=True)   # divide -> EUP
    return g * (diff * inv) + b


# ------------------------------ fused block kernel -----------------------------

def fused_block_kernel(*refs, num_heads, with_filter):
    """One full TransformerBlock (optionally with the FilterLayer residual+LN prologue)."""
    ctx_ref = refs[-1]          # VMEM scratch (L, H) f32 — per-head context assembly
    o_ref = refs[-2]
    ins = refs[:-2]

    if with_filter:
        (emb_ref, xf_ref, fg_ref, fb_ref, bias_ref,
         wqkv_ref, bqkv_ref, wo_ref, bo_ref, ln1_g_ref, ln1_b_ref,
         w1_ref, b1_ref, w2_ref, b2_ref, ln2_g_ref, ln2_b_ref) = ins
        # FMLP FilterLayer tail: LayerNorm(filter_out + input), biased var, eps=1e-12.
        xr = emb_ref[0] + xf_ref[0]                              # (L, H) f32
        mean = jnp.mean(xr, axis=-1, keepdims=True)
        var = jnp.mean((xr - mean) ** 2, axis=-1, keepdims=True)
        x = fg_ref[...] * ((xr - mean) * jax.lax.rsqrt(var + 1e-12)) + fb_ref[...]
    else:
        (x_ref, bias_ref,
         wqkv_ref, bqkv_ref, wo_ref, bo_ref, ln1_g_ref, ln1_b_ref,
         w1_ref, b1_ref, w2_ref, b2_ref, ln2_g_ref, ln2_b_ref) = ins
        x = x_ref[0]                                             # (L, H) f32

    L, H = x.shape
    dk = H // num_heads
    neg_bias = bias_ref[0]      # (1, L) additive key mask: 0.0 attend / -1e9 masked

    # ---- input sublayer: x + MultiHeadAttention(LN(x)) ----
    xn = _bert4rec_layernorm(x, ln1_g_ref[...], ln1_b_ref[...], 1e-6)
    qkv = jnp.dot(xn.astype(wqkv_ref.dtype), wqkv_ref[...],
                  preferred_element_type=jnp.float32) + bqkv_ref[...]   # (L, 3H) f32
    # 1/sqrt(dk) already folded into the Q columns of wqkv / bqkv.
    q = qkv[:, 0 * H:1 * H].astype(jnp.bfloat16)
    k = qkv[:, 1 * H:2 * H].astype(jnp.bfloat16)
    v = qkv[:, 2 * H:3 * H].astype(jnp.bfloat16)

    for h in range(num_heads):          # static unroll; K=dk is inherent to per-head scores
        qh = q[:, h * dk:(h + 1) * dk]
        kh = k[:, h * dk:(h + 1) * dk]
        vh = v[:, h * dk:(h + 1) * dk]
        s = jax.lax.dot_general(qh, kh, (((1,), (1,)), ((), ())),
                                preferred_element_type=jnp.float32)     # (L, L) f32
        s = s + neg_bias                                                # hoisted mask add
        m = jnp.max(s, axis=-1, keepdims=True)
        e = jnp.exp(s - m)
        p = e * pl.reciprocal(jnp.sum(e, axis=-1, keepdims=True), approx=True)
        ctx_ref[:, h * dk:(h + 1) * dk] = jnp.dot(
            p.astype(jnp.bfloat16), vh, preferred_element_type=jnp.float32)

    # single output projection on the concatenated context (K = H)
    attn = jnp.dot(ctx_ref[...].astype(wo_ref.dtype), wo_ref[...],
                   preferred_element_type=jnp.float32) + bo_ref[...]
    x = x + attn

    # ---- output sublayer: x + FFN(LN(x)), FFN = W2(gelu(W1 x)) ----
    xn2 = _bert4rec_layernorm(x, ln2_g_ref[...], ln2_b_ref[...], 1e-6)
    h1 = jnp.dot(xn2.astype(w1_ref.dtype), w1_ref[...],
                 preferred_element_type=jnp.float32) + b1_ref[...]
    h1 = _gelu(h1)
    h2 = jnp.dot(h1.astype(w2_ref.dtype), w2_ref[...],
                 preferred_element_type=jnp.float32) + b2_ref[...]
    o_ref[0] = (x + h2).astype(o_ref.dtype)


# ------------------------------ Pallas wrapper ---------------------------------

def _full_spec(shape):
    nd = len(shape)
    return pl.BlockSpec(shape, lambda i, _nd=nd: (0,) * _nd)


def _vmem_limit_bytes(operands, out_block_bytes):
    # resident blocks x2 (double-buffered pipeline) + headroom, clamped under v7x's 64 MiB.
    tot = sum(int(o.size) * o.dtype.itemsize for o in operands) + out_block_bytes
    tot = int(1.5 * (2 * tot)) + (4 << 20)
    return max(32 << 20, min(tot, 56 << 20))


def fused_block(x, attn_bias, blk, num_heads, *, filter_inputs=None):
    """x: (B, L, H) f32, attn_bias: (B, 1, L) f32 additive key mask.
    filter_inputs: None, or (xf, filter_ln_g, filter_ln_b) to fuse the FilterLayer
    residual + LayerNorm(eps=1e-12) as a prologue (used for the first block only)."""
    B, L, H = x.shape
    act_spec = pl.BlockSpec((1, L, H), lambda i: (i, 0, 0))
    bias_spec = pl.BlockSpec((1, 1, L), lambda i: (i, 0, 0))

    if filter_inputs is not None:
        xf, fg, fb = filter_inputs
        lead_ops = [x, xf, fg, fb, attn_bias]
        lead_specs = [act_spec, act_spec, _full_spec(fg.shape), _full_spec(fb.shape), bias_spec]
        with_filter = True
    else:
        lead_ops = [x, attn_bias]
        lead_specs = [act_spec, bias_spec]
        with_filter = False

    w_ops = [blk["wqkv"], blk["bqkv"], blk["wo"], blk["bo"],
             blk["ln1_g"], blk["ln1_b"],
             blk["w1"], blk["b1"], blk["w2"], blk["b2"],
             blk["ln2_g"], blk["ln2_b"]]
    w_specs = [_full_spec(o.shape) for o in w_ops]

    operands = lead_ops + w_ops
    in_specs = lead_specs + w_specs

    return pl.pallas_call(
        functools.partial(fused_block_kernel, num_heads=num_heads, with_filter=with_filter),
        out_shape=jax.ShapeDtypeStruct((B, L, H), jnp.float32),
        grid=(B,),
        in_specs=in_specs,
        out_specs=act_spec,
        scratch_shapes=[pltpu.VMEM((L, H), jnp.float32)],
        compiler_params=pltpu.CompilerParams(
            dimension_semantics=("parallel",),
            vmem_limit_bytes=_vmem_limit_bytes(operands, L * H * 4),
        ),
    )(*operands)


# --------------------------------- full model ----------------------------------

def bert_forward(tokens, params, *, vocab_size, num_heads):
    B, L = tokens.shape

    # PyTorch: mask = (x < vocab_size-1).unsqueeze(1).repeat(1,L,1).unsqueeze(1) -> key mask.
    # Shipped as a (B, 1, L) additive bias (0 attend / -1e9 masked); broadcast over
    # queries and heads inside the kernel.
    valid = tokens < (vocab_size - 1)
    attn_bias = jnp.where(valid, 0.0, -1e9).astype(jnp.float32)[:, None, :]    # (B, 1, L)

    # BERTEmbedding: token + learned positional embedding; dropout = identity (eval).
    x = params["token_emb"][tokens] + params["pos_emb"][None, :L, :]
    x = x.astype(jnp.float32)

    # FilterLayer FFT part in plain JAX.
    # TODO(synk): rfft/irfft have no clean Pallas TPU equivalent; they stay in XLA.
    xc = jnp.fft.rfft(x, axis=1, norm="ortho")
    wc = params["filter_w"][..., 0] + 1j * params["filter_w"][..., 1]          # (1, L//2+1, H)
    xf = jnp.fft.irfft(xc * wc, n=L, axis=1, norm="ortho").astype(jnp.float32)

    blocks = params["blocks"]
    if not blocks:  # degenerate config: just the FilterLayer residual + LayerNorm
        xr = x + xf
        mean = jnp.mean(xr, axis=-1, keepdims=True)
        var = jnp.mean((xr - mean) ** 2, axis=-1, keepdims=True)
        return (params["filter_ln_g"] * (xr - mean) / jnp.sqrt(var + 1e-12)
                + params["filter_ln_b"])

    # Block 0 fuses the FilterLayer residual+LN prologue; remaining blocks are plain.
    for i, blk in enumerate(blocks):
        if i == 0:
            x = fused_block(x, attn_bias, blk, num_heads,
                            filter_inputs=(xf, params["filter_ln_g"], params["filter_ln_b"]))
        else:
            x = fused_block(x, attn_bias, blk, num_heads)
        # TransformerBlock's trailing dropout is identity in eval mode.
    return x


# ------------------------------ parameter init ----------------------------------

def _linear(key, d_in, d_out):
    w = 0.02 * jax.random.normal(key, (d_in, d_out), dtype=jnp.float32)
    b = jnp.zeros((1, d_out), dtype=jnp.float32)
    return w, b


def init_params(key, *, vocab_size, max_len, hidden, n_layers, num_heads):
    keys = jax.random.split(key, 3 + 6 * n_layers)
    ki = iter(keys)
    params = {
        "token_emb": 0.02 * jax.random.normal(next(ki), (vocab_size, hidden), dtype=jnp.float32),
        "pos_emb": 0.02 * jax.random.normal(next(ki), (max_len, hidden), dtype=jnp.float32),
        "filter_w": 0.02 * jax.random.normal(next(ki), (1, max_len // 2 + 1, hidden, 2),
                                             dtype=jnp.float32),
        "filter_ln_g": jnp.ones((1, hidden), dtype=jnp.float32),
        "filter_ln_b": jnp.zeros((1, hidden), dtype=jnp.float32),
        "blocks": [],
    }
    ffn = 4 * hidden
    dk = hidden // num_heads
    scale = 1.0 / math.sqrt(dk)
    for _ in range(n_layers):
        wq, bq = _linear(next(ki), hidden, hidden)
        wk, bk = _linear(next(ki), hidden, hidden)
        wv, bv = _linear(next(ki), hidden, hidden)
        wo, bo = _linear(next(ki), hidden, hidden)
        w1, b1 = _linear(next(ki), hidden, ffn)
        w2, b2 = _linear(next(ki), ffn, hidden)
        blk = {
            # fused QKV projection; 1/sqrt(dk) folded into the Q columns (zero kernel cost).
            # MXU matmul weights stored in bf16; biases / LN params stay f32.
            "wqkv": jnp.concatenate([wq * scale, wk, wv], axis=1).astype(jnp.bfloat16),
            "bqkv": jnp.concatenate([bq * scale, bk, bv], axis=1),
            "wo": wo.astype(jnp.bfloat16), "bo": bo,
            "ln1_g": jnp.ones((1, hidden), dtype=jnp.float32),
            "ln1_b": jnp.zeros((1, hidden), dtype=jnp.float32),
            "w1": w1.astype(jnp.bfloat16), "b1": b1,
            "w2": w2.astype(jnp.bfloat16), "b2": b2,
            "ln2_g": jnp.ones((1, hidden), dtype=jnp.float32),
            "ln2_b": jnp.zeros((1, hidden), dtype=jnp.float32),
        }
        params["blocks"].append(blk)
    return params


# ----------------------------------- main ---------------------------------------

if __name__ == "__main__":
    B = 2            # batch
    L = 8            # bert_max_len
    H = 32           # bert_hidden_units
    HEADS = 2        # bert_num_heads
    LAYERS = 2       # bert_num_blocks
    NUM_ITEMS = 50
    VOCAB = NUM_ITEMS + 1   # 51; token id 50 acts as mask/pad -> masked key positions

    key = jax.random.PRNGKey(0)
    k_param, k_tok = jax.random.split(key)
    params = init_params(k_param, vocab_size=VOCAB, max_len=L, hidden=H,
                         n_layers=LAYERS, num_heads=HEADS)
    tokens = jax.random.randint(k_tok, (B, L), 0, VOCAB, dtype=jnp.int32)

    fwd = jax.jit(functools.partial(bert_forward, vocab_size=VOCAB, num_heads=HEADS))
    out = fwd(tokens, params)
    out = jax.block_until_ready(out)
    assert out.shape == (B, L, H) and out.dtype == jnp.float32
    print("KERNEL_OK")
</pallas_src>

<mosaic_0001>
module attributes {stable_mosaic.version = 11 : i64} {
  func.func @fused_block_kernel(%arg0: i32, %arg1: memref<1x8x32xf32, #tpu.memory_space<vmem>>, %arg2: memref<1x1x8xf32, #tpu.memory_space<vmem>>, %arg3: memref<32x96xbf16, #tpu.memory_space<vmem>>, %arg4: memref<1x96xf32, #tpu.memory_space<vmem>>, %arg5: memref<32x32xbf16, #tpu.memory_space<vmem>>, %arg6: memref<1x32xf32, #tpu.memory_space<vmem>>, %arg7: memref<1x32xf32, #tpu.memory_space<vmem>>, %arg8: memref<1x32xf32, #tpu.memory_space<vmem>>, %arg9: memref<32x128xbf16, #tpu.memory_space<vmem>>, %arg10: memref<1x128xf32, #tpu.memory_space<vmem>>, %arg11: memref<128x32xbf16, #tpu.memory_space<vmem>>, %arg12: memref<1x32xf32, #tpu.memory_space<vmem>>, %arg13: memref<1x32xf32, #tpu.memory_space<vmem>>, %arg14: memref<1x32xf32, #tpu.memory_space<vmem>>, %arg15: memref<1x8x32xf32, #tpu.memory_space<vmem>>, %arg16: memref<8x32xf32, #tpu.memory_space<vmem>>) attributes {dimension_semantics = [#tpu.dimension_semantics<parallel>], iteration_bounds = array<i64: 2>, scalar_prefetch = 0 : i64, scratch_operands = 1 : i64, tpu.core_type = #tpu.core_type<tc>, window_params = [{transform_indices = @transform_0, window_bounds = array<i64: 1, 8, 32>}, {transform_indices = @transform_1, window_bounds = array<i64: 1, 1, 8>}, {pipeline_mode = #tpu.pipeline_mode<synchronous>, transform_indices = @transform_2, window_bounds = array<i64: 32, 96>}, {pipeline_mode = #tpu.pipeline_mode<synchronous>, transform_indices = @transform_3, window_bounds = array<i64: 1, 96>}, {pipeline_mode = #tpu.pipeline_mode<synchronous>, transform_indices = @transform_4, window_bounds = array<i64: 32, 32>}, {pipeline_mode = #tpu.pipeline_mode<synchronous>, transform_indices = @transform_5, window_bounds = array<i64: 1, 32>}, {pipeline_mode = #tpu.pipeline_mode<synchronous>, transform_indices = @transform_6, window_bounds = array<i64: 1, 32>}, {pipeline_mode = #tpu.pipeline_mode<synchronous>, transform_indices = @transform_7, window_bounds = array<i64: 1, 32>}, {pipeline_mode = #tpu.pipeline_mode<synchronous>, transform_indices = @transform_8, window_bounds = array<i64: 32, 128>}, {pipeline_mode = #tpu.pipeline_mode<synchronous>, transform_indices = @transform_9, window_bounds = array<i64: 1, 128>}, {pipeline_mode = #tpu.pipeline_mode<synchronous>, transform_indices = @transform_10, window_bounds = array<i64: 128, 32>}, {pipeline_mode = #tpu.pipeline_mode<synchronous>, transform_indices = @transform_11, window_bounds = array<i64: 1, 32>}, {pipeline_mode = #tpu.pipeline_mode<synchronous>, transform_indices = @transform_12, window_bounds = array<i64: 1, 32>}, {pipeline_mode = #tpu.pipeline_mode<synchronous>, transform_indices = @transform_13, window_bounds = array<i64: 1, 32>}, {transform_indices = @transform_14, window_bounds = array<i64: 1, 8, 32>}]} {
    %c0 = arith.constant 0 : index
    %c0_0 = arith.constant 0 : index
    %c0_1 = arith.constant 0 : index
    %0 = vector.load %arg1[%c0, %c0_0, %c0_1] : memref<1x8x32xf32, #tpu.memory_space<vmem>>, vector<1x8x32xf32>
    %1 = vector.shape_cast %0 : vector<1x8x32xf32> to vector<8x32xf32>
    %c0_2 = arith.constant 0 : index
    %c0_3 = arith.constant 0 : index
    %c0_4 = arith.constant 0 : index
    %2 = vector.load %arg2[%c0_2, %c0_3, %c0_4] : memref<1x1x8xf32, #tpu.memory_space<vmem>>, vector<1x1x8xf32>
    %3 = vector.shape_cast %2 : vector<1x1x8xf32> to vector<1x8xf32>
    %c0_5 = arith.constant 0 : index
    %c0_6 = arith.constant 0 : index
    %4 = vector.load %arg7[%c0_5, %c0_6] : memref<1x32xf32, #tpu.memory_space<vmem>>, vector<1x32xf32>
    %c0_7 = arith.constant 0 : index
    %c0_8 = arith.constant 0 : index
    %5 = vector.load %arg8[%c0_7, %c0_8] : memref<1x32xf32, #tpu.memory_space<vmem>>, vector<1x32xf32>
    %cst = arith.constant dense<0.000000e+00> : vector<8xf32>
    %6 = vector.multi_reduction <add>, %1, %cst [1] : vector<8x32xf32> to vector<8xf32>
    %7 = vector.shape_cast %6 : vector<8xf32> to vector<8x1xf32>
    %cst_9 = arith.constant 3.200000e+01 : f32
    %8 = vector.broadcast %cst_9 : f32 to vector<8x1xf32>
    %9 = arith.divf %7, %8 : vector<8x1xf32>
    %10 = vector.broadcast %9 : vector<8x1xf32> to vector<8x32xf32>
    %11 = arith.subf %1, %10 : vector<8x32xf32>
    %12 = arith.mulf %11, %11 : vector<8x32xf32>
    %cst_10 = arith.constant dense<0.000000e+00> : vector<8xf32>
    %13 = vector.multi_reduction <add>, %12, %cst_10 [1] : vector<8x32xf32> to vector<8xf32>
    %14 = vector.shape_cast %13 : vector<8xf32> to vector<8x1xf32>
    %cst_11 = arith.constant 0.0322580636 : f32
    %15 = vector.broadcast %cst_11 : f32 to vector<8x1xf32>
    %16 = arith.mulf %14, %15 : vector<8x1xf32>
    %17 = math.sqrt %16 : vector<8x1xf32>
    %cst_12 = arith.constant 9.99999997E-7 : f32
    %18 = vector.broadcast %cst_12 : f32 to vector<8x1xf32>
    %19 = arith.addf %17, %18 : vector<8x1xf32>
    %20 = tpu.reciprocal %19 {approx = true} : vector<8x1xf32> -> vector<8x1xf32>
    %21 = vector.broadcast %20 : vector<8x1xf32> to vector<8x32xf32>
    %22 = arith.mulf %11, %21 : vector<8x32xf32>
    %23 = vector.broadcast %4 : vector<1x32xf32> to vector<8x32xf32>
    %24 = arith.mulf %23, %22 : vector<8x32xf32>
    %25 = vector.broadcast %5 : vector<1x32xf32> to vector<8x32xf32>
    %26 = arith.addf %24, %25 : vector<8x32xf32>
    %27 = arith.truncf %26 : vector<8x32xf32> to vector<8x32xbf16>
    %c0_13 = arith.constant 0 : index
    %c0_14 = arith.constant 0 : index
    %28 = vector.load %arg3[%c0_13, %c0_14] : memref<32x96xbf16, #tpu.memory_space<vmem>>, vector<32x96xbf16>
    %cst_15 = arith.constant dense<0.000000e+00> : vector<8x96xf32>
    %29 = tpu.matmul %27, %28, %cst_15 {dimension_numbers = #tpu.dot_dimension_numbers<[1], [0], [0], [1], [0, 0, 1, 1], [], []>} : vector<8x32xbf16>, vector<32x96xbf16>, vector<8x96xf32> -> vector<8x96xf32>
    %c0_16 = arith.constant 0 : index
    %c0_17 = arith.constant 0 : index
    %30 = vector.load %arg4[%c0_16, %c0_17] : memref<1x96xf32, #tpu.memory_space<vmem>>, vector<1x96xf32>
    %31 = vector.broadcast %30 : vector<1x96xf32> to vector<8x96xf32>
    %32 = arith.addf %29, %31 : vector<8x96xf32>
    %33 = vector.extract_strided_slice %32 {offsets = [0, 0], sizes = [8, 32], strides = [1, 1]} : vector<8x96xf32> to vector<8x32xf32>
    %34 = arith.truncf %33 : vector<8x32xf32> to vector<8x32xbf16>
    %35 = vector.extract_strided_slice %32 {offsets = [0, 32], sizes = [8, 32], strides = [1, 1]} : vector<8x96xf32> to vector<8x32xf32>
    %36 = arith.truncf %35 : vector<8x32xf32> to vector<8x32xbf16>
    %37 = vector.extract_strided_slice %32 {offsets = [0, 64], sizes = [8, 32], strides = [1, 1]} : vector<8x96xf32> to vector<8x32xf32>
    %38 = arith.truncf %37 : vector<8x32xf32> to vector<8x32xbf16>
    %39 = vector.extract_strided_slice %34 {offsets = [0, 0], sizes = [8, 16], strides = [1, 1]} : vector<8x32xbf16> to vector<8x16xbf16>
    %40 = vector.extract_strided_slice %36 {offsets = [0, 0], sizes = [8, 16], strides = [1, 1]} : vector<8x32xbf16> to vector<8x16xbf16>
    %41 = vector.extract_strided_slice %38 {offsets = [0, 0], sizes = [8, 16], strides = [1, 1]} : vector<8x32xbf16> to vector<8x16xbf16>
    %cst_18 = arith.constant dense<0.000000e+00> : vector<8x8xf32>
    %42 = tpu.matmul %39, %40, %cst_18 {dimension_numbers = #tpu.dot_dimension_numbers<[1], [1], [0], [0], [0, 0, 1, 0], [], []>} : vector<8x16xbf16>, vector<8x16xbf16>, vector<8x8xf32> -> vector<8x8xf32>
    %43 = vector.broadcast %3 : vector<1x8xf32> to vector<8x8xf32>
    %44 = arith.addf %42, %43 : vector<8x8xf32>
    %cst_19 = arith.constant dense<0xFF800000> : vector<8xf32>
    %45 = vector.multi_reduction <maximumf>, %44, %cst_19 [1] : vector<8x8xf32> to vector<8xf32>
    %46 = vector.shape_cast %45 : vector<8xf32> to vector<8x1xf32>
    %47 = vector.broadcast %46 : vector<8x1xf32> to vector<8x8xf32>
    %48 = arith.subf %44, %47 : vector<8x8xf32>
    %49 = math.exp %48 : vector<8x8xf32>
    %cst_20 = arith.constant dense<0.000000e+00> : vector<8xf32>
    %50 = vector.multi_reduction <add>, %49, %cst_20 [1] : vector<8x8xf32> to vector<8xf32>
    %51 = vector.shape_cast %50 : vector<8xf32> to vector<8x1xf32>
    %52 = tpu.reciprocal %51 {approx = true} : vector<8x1xf32> -> vector<8x1xf32>
    %53 = vector.broadcast %52 : vector<8x1xf32> to vector<8x8xf32>
    %54 = arith.mulf %49, %53 : vector<8x8xf32>
    %55 = arith.truncf %54 : vector<8x8xf32> to vector<8x8xbf16>
    %cst_21 = arith.constant dense<0.000000e+00> : vector<8x16xf32>
    %56 = tpu.matmul %55, %41, %cst_21 {dimension_numbers = #tpu.dot_dimension_numbers<[1], [0], [0], [1], [0, 0, 1, 1], [], []>} : vector<8x8xbf16>, vector<8x16xbf16>, vector<8x16xf32> -> vector<8x16xf32>
    %c0_22 = arith.constant 0 : index
    %c0_23 = arith.constant 0 : index
    %57 = vector.load %arg16[%c0_22, %c0_23] : memref<8x32xf32, #tpu.memory_space<vmem>>, vector<8x16xf32>
    tpu.vector_store %arg16[%c0_22, %c0_23], %56 {strides = array<i32>} : memref<8x32xf32, #tpu.memory_space<vmem>>, vector<8x16xf32>,
    %58 = vector.extract_strided_slice %34 {offsets = [0, 16], sizes = [8, 16], strides = [1, 1]} : vector<8x32xbf16> to vector<8x16xbf16>
    %59 = vector.extract_strided_slice %36 {offsets = [0, 16], sizes = [8, 16], strides = [1, 1]} : vector<8x32xbf16> to vector<8x16xbf16>
    %60 = vector.extract_strided_slice %38 {offsets = [0, 16], sizes = [8, 16], strides = [1, 1]} : vector<8x32xbf16> to vector<8x16xbf16>
    %cst_24 = arith.constant dense<0.000000e+00> : vector<8x8xf32>
    %61 = tpu.matmul %58, %59, %cst_24 {dimension_numbers = #tpu.dot_dimension_numbers<[1], [1], [0], [0], [0, 0, 1, 0], [], []>} : vector<8x16xbf16>, vector<8x16xbf16>, vector<8x8xf32> -> vector<8x8xf32>
    %62 = vector.broadcast %3 : vector<1x8xf32> to vector<8x8xf32>
    %63 = arith.addf %61, %62 : vector<8x8xf32>
    %cst_25 = arith.constant dense<0xFF800000> : vector<8xf32>
    %64 = vector.multi_reduction <maximumf>, %63, %cst_25 [1] : vector<8x8xf32> to vector<8xf32>
    %65 = vector.shape_cast %64 : vector<8xf32> to vector<8x1xf32>
    %66 = vector.broadcast %65 : vector<8x1xf32> to vector<8x8xf32>
    %67 = arith.subf %63, %66 : vector<8x8xf32>
    %68 = math.exp %67 : vector<8x8xf32>
    %cst_26 = arith.constant dense<0.000000e+00> : vector<8xf32>
    %69 = vector.multi_reduction <add>, %68, %cst_26 [1] : vector<8x8xf32> to vector<8xf32>
    %70 = vector.shape_cast %69 : vector<8xf32> to vector<8x1xf32>
    %71 = tpu.reciprocal %70 {approx = true} : vector<8x1xf32> -> vector<8x1xf32>
    %72 = vector.broadcast %71 : vector<8x1xf32> to vector<8x8xf32>
    %73 = arith.mulf %68, %72 : vector<8x8xf32>
    %74 = arith.truncf %73 : vector<8x8xf32> to vector<8x8xbf16>
    %cst_27 = arith.constant dense<0.000000e+00> : vector<8x16xf32>
    %75 = tpu.matmul %74, %60, %cst_27 {dimension_numbers = #tpu.dot_dimension_numbers<[1], [0], [0], [1], [0, 0, 1, 1], [], []>} : vector<8x8xbf16>, vector<8x16xbf16>, vector<8x16xf32> -> vector<8x16xf32>
    %c0_28 = arith.constant 0 : index
    %c16 = arith.constant 16 : index
    %76 = vector.load %arg16[%c0_28, %c16] : memref<8x32xf32, #tpu.memory_space<vmem>>, vector<8x16xf32>
    tpu.vector_store %arg16[%c0_28, %c16], %75 {strides = array<i32>} : memref<8x32xf32, #tpu.memory_space<vmem>>, vector<8x16xf32>,
    %c0_29 = arith.constant 0 : index
    %c0_30 = arith.constant 0 : index
    %77 = vector.load %arg16[%c0_29, %c0_30] : memref<8x32xf32, #tpu.memory_space<vmem>>, vector<8x32xf32>
    %78 = arith.truncf %77 : vector<8x32xf32> to vector<8x32xbf16>
    %c0_31 = arith.constant 0 : index
    %c0_32 = arith.constant 0 : index
    %79 = vector.load %arg5[%c0_31, %c0_32] : memref<32x32xbf16, #tpu.memory_space<vmem>>, vector<32x32xbf16>
    %cst_33 = arith.constant dense<0.000000e+00> : vector<8x32xf32>
    %80 = tpu.matmul %78, %79, %cst_33 {dimension_numbers = #tpu.dot_dimension_numbers<[1], [0], [0], [1], [0, 0, 1, 1], [], []>} : vector<8x32xbf16>, vector<32x32xbf16>, vector<8x32xf32> -> vector<8x32xf32>
    %c0_34 = arith.constant 0 : index
    %c0_35 = arith.constant 0 : index
    %81 = vector.load %arg6[%c0_34, %c0_35] : memref<1x32xf32, #tpu.memory_space<vmem>>, vector<1x32xf32>
    %82 = vector.broadcast %81 : vector<1x32xf32> to vector<8x32xf32>
    %83 = arith.addf %80, %82 : vector<8x32xf32>
    %84 = arith.addf %1, %83 : vector<8x32xf32>
    %c0_36 = arith.constant 0 : index
    %c0_37 = arith.constant 0 : index
    %85 = vector.load %arg13[%c0_36, %c0_37] : memref<1x32xf32, #tpu.memory_space<vmem>>, vector<1x32xf32>
    %c0_38 = arith.constant 0 : index
    %c0_39 = arith.constant 0 : index
    %86 = vector.load %arg14[%c0_38, %c0_39] : memref<1x32xf32, #tpu.memory_space<vmem>>, vector<1x32xf32>
    %cst_40 = arith.constant dense<0.000000e+00> : vector<8xf32>
    %87 = vector.multi_reduction <add>, %84, %cst_40 [1] : vector<8x32xf32> to vector<8xf32>
    %88 = vector.shape_cast %87 : vector<8xf32> to vector<8x1xf32>
    %cst_41 = arith.constant 3.200000e+01 : f32
    %89 = vector.broadcast %cst_41 : f32 to vector<8x1xf32>
    %90 = arith.divf %88, %89 : vector<8x1xf32>
    %91 = vector.broadcast %90 : vector<8x1xf32> to vector<8x32xf32>
    %92 = arith.subf %84, %91 : vector<8x32xf32>
    %93 = arith.mulf %92, %92 : vector<8x32xf32>
    %cst_42 = arith.constant dense<0.000000e+00> : vector<8xf32>
    %94 = vector.multi_reduction <add>, %93, %cst_42 [1] : vector<8x32xf32> to vector<8xf32>
    %95 = vector.shape_cast %94 : vector<8xf32> to vector<8x1xf32>
    %cst_43 = arith.constant 0.0322580636 : f32
    %96 = vector.broadcast %cst_43 : f32 to vector<8x1xf32>
    %97 = arith.mulf %95, %96 : vector<8x1xf32>
    %98 = math.sqrt %97 : vector<8x1xf32>
    %cst_44 = arith.constant 9.99999997E-7 : f32
    %99 = vector.broadcast %cst_44 : f32 to vector<8x1xf32>
    %100 = arith.addf %98, %99 : vector<8x1xf32>
    %101 = tpu.reciprocal %100 {approx = true} : vector<8x1xf32> -> vector<8x1xf32>
    %102 = vector.broadcast %101 : vector<8x1xf32> to vector<8x32xf32>
    %103 = arith.mulf %92, %102 : vector<8x32xf32>
    %104 = vector.broadcast %85 : vector<1x32xf32> to vector<8x32xf32>
    %105 = arith.mulf %104, %103 : vector<8x32xf32>
    %106 = vector.broadcast %86 : vector<1x32xf32> to vector<8x32xf32>
    %107 = arith.addf %105, %106 : vector<8x32xf32>
    %108 = arith.truncf %107 : vector<8x32xf32> to vector<8x32xbf16>
    %c0_45 = arith.constant 0 : index
    %c0_46 = arith.constant 0 : index
    %109 = vector.load %arg9[%c0_45, %c0_46] : memref<32x128xbf16, #tpu.memory_space<vmem>>, vector<32x128xbf16>
    %cst_47 = arith.constant dense<0.000000e+00> : vector<8x128xf32>
    %110 = tpu.matmul %108, %109, %cst_47 {dimension_numbers = #tpu.dot_dimension_numbers<[1], [0], [0], [1], [0, 0, 1, 1], [], []>} : vector<8x32xbf16>, vector<32x128xbf16>, vector<8x128xf32> -> vector<8x128xf32>
    %c0_48 = arith.constant 0 : index
    %c0_49 = arith.constant 0 : index
    %111 = vector.load %arg10[%c0_48, %c0_49] : memref<1x128xf32, #tpu.memory_space<vmem>>, vector<1x128xf32>
    %112 = vector.broadcast %111 : vector<1x128xf32> to vector<8x128xf32>
    %113 = arith.addf %110, %112 : vector<8x128xf32>
    %cst_50 = arith.constant 5.000000e-01 : f32
    %114 = vector.broadcast %cst_50 : f32 to vector<8x128xf32>
    %115 = arith.mulf %114, %113 : vector<8x128xf32>
    %116 = arith.mulf %113, %113 : vector<8x128xf32>
    %117 = arith.mulf %116, %113 : vector<8x128xf32>
    %cst_51 = arith.constant 4.471500e-02 : f32
    %118 = vector.broadcast %cst_51 : f32 to vector<8x128xf32>
    %119 = arith.mulf %118, %117 : vector<8x128xf32>
    %120 = arith.addf %113, %119 : vector<8x128xf32>
    %cst_52 = arith.constant 0.797884583 : f32
    %121 = vector.broadcast %cst_52 : f32 to vector<8x128xf32>
    %122 = arith.mulf %121, %120 : vector<8x128xf32>
    %123 = math.tanh %122 : vector<8x128xf32>
    %cst_53 = arith.constant 1.000000e+00 : f32
    %124 = vector.broadcast %cst_53 : f32 to vector<8x128xf32>
    %125 = arith.addf %124, %123 : vector<8x128xf32>
    %126 = arith.mulf %115, %125 : vector<8x128xf32>
    %127 = arith.truncf %126 : vector<8x128xf32> to vector<8x128xbf16>
    %c0_54 = arith.constant 0 : index
    %c0_55 = arith.constant 0 : index
    %128 = vector.load %arg11[%c0_54, %c0_55] : memref<128x32xbf16, #tpu.memory_space<vmem>>, vector<128x32xbf16>
    %cst_56 = arith.constant dense<0.000000e+00> : vector<8x32xf32>
    %129 = tpu.matmul %127, %128, %cst_56 {dimension_numbers = #tpu.dot_dimension_numbers<[1], [0], [0], [1], [0, 0, 1, 1], [], []>} : vector<8x128xbf16>, vector<128x32xbf16>, vector<8x32xf32> -> vector<8x32xf32>
    %c0_57 = arith.constant 0 : index
    %c0_58 = arith.constant 0 : index
    %130 = vector.load %arg12[%c0_57, %c0_58] : memref<1x32xf32, #tpu.memory_space<vmem>>, vector<1x32xf32>
    %131 = vector.broadcast %130 : vector<1x32xf32> to vector<8x32xf32>
    %132 = arith.addf %129, %131 : vector<8x32xf32>
    %133 = arith.addf %84, %132 : vector<8x32xf32>
    %c0_59 = arith.constant 0 : index
    %c0_60 = arith.constant 0 : index
    %c0_61 = arith.constant 0 : index
    %134 = vector.load %arg15[%c0_59, %c0_60, %c0_61] : memref<1x8x32xf32, #tpu.memory_space<vmem>>, vector<1x8x32xf32>
    %135 = vector.shape_cast %134 : vector<1x8x32xf32> to vector<8x32xf32>
    %136 = vector.shape_cast %133 : vector<8x32xf32> to vector<1x8x32xf32>
    tpu.vector_store %arg15[%c0_59, %c0_60, %c0_61], %136 {strides = array<i32>} : memref<1x8x32xf32, #tpu.memory_space<vmem>>, vector<1x8x32xf32>,
    return
  }
  func.func @transform_0(%arg0: i32) -> (i32, i32, i32) {
    %c0_i32 = arith.constant 0 : i32
    %c0_i32_0 = arith.constant 0 : i32
    %c0_i32_1 = arith.constant 0 : i32
    return %arg0, %c0_i32, %c0_i32_0 : i32, i32, i32
  }
  func.func @transform_1(%arg0: i32) -> (i32, i32, i32) {
    %c0_i32 = arith.constant 0 : i32
    %c0_i32_0 = arith.constant 0 : i32
    %c0_i32_1 = arith.constant 0 : i32
    return %arg0, %c0_i32, %c0_i32_0 : i32, i32, i32
  }
  func.func @transform_2(%arg0: i32) -> (i32, i32) {
    %c0_i32 = arith.constant 0 : i32
    %c0_i32_0 = arith.constant 0 : i32
    %c0_i32_1 = arith.constant 0 : i32
    return %c0_i32, %c0_i32_0 : i32, i32
  }
  func.func @transform_3(%arg0: i32) -> (i32, i32) {
    %c0_i32 = arith.constant 0 : i32
    %c0_i32_0 = arith.constant 0 : i32
    %c0_i32_1 = arith.constant 0 : i32
    return %c0_i32, %c0_i32_0 : i32, i32
  }
  func.func @transform_4(%arg0: i32) -> (i32, i32) {
    %c0_i32 = arith.constant 0 : i32
    %c0_i32_0 = arith.constant 0 : i32
    %c0_i32_1 = arith.constant 0 : i32
    return %c0_i32, %c0_i32_0 : i32, i32
  }
  func.func @transform_5(%arg0: i32) -> (i32, i32) {
    %c0_i32 = arith.constant 0 : i32
    %c0_i32_0 = arith.constant 0 : i32
    %c0_i32_1 = arith.constant 0 : i32
    return %c0_i32, %c0_i32_0 : i32, i32
  }
  func.func @transform_6(%arg0: i32) -> (i32, i32) {
    %c0_i32 = arith.constant 0 : i32
    %c0_i32_0 = arith.constant 0 : i32
    %c0_i32_1 = arith.constant 0 : i32
    return %c0_i32, %c0_i32_0 : i32, i32
  }
  func.func @transform_7(%arg0: i32) -> (i32, i32) {
    %c0_i32 = arith.constant 0 : i32
    %c0_i32_0 = arith.constant 0 : i32
    %c0_i32_1 = arith.constant 0 : i32
    return %c0_i32, %c0_i32_0 : i32, i32
  }
  func.func @transform_8(%arg0: i32) -> (i32, i32) {
    %c0_i32 = arith.constant 0 : i32
    %c0_i32_0 = arith.constant 0 : i32
    %c0_i32_1 = arith.constant 0 : i32
    return %c0_i32, %c0_i32_0 : i32, i32
  }
  func.func @transform_9(%arg0: i32) -> (i32, i32) {
    %c0_i32 = arith.constant 0 : i32
    %c0_i32_0 = arith.constant 0 : i32
    %c0_i32_1 = arith.constant 0 : i32
    return %c0_i32, %c0_i32_0 : i32, i32
  }
  func.func @transform_10(%arg0: i32) -> (i32, i32) {
    %c0_i32 = arith.constant 0 : i32
    %c0_i32_0 = arith.constant 0 : i32
    %c0_i32_1 = arith.constant 0 : i32
    return %c0_i32, %c0_i32_0 : i32, i32
  }
  func.func @transform_11(%arg0: i32) -> (i32, i32) {
    %c0_i32 = arith.constant 0 : i32
    %c0_i32_0 = arith.constant 0 : i32
    %c0_i32_1 = arith.constant 0 : i32
    return %c0_i32, %c0_i32_0 : i32, i32
  }
  func.func @transform_12(%arg0: i32) -> (i32, i32) {
    %c0_i32 = arith.constant 0 : i32
    %c0_i32_0 = arith.constant 0 : i32
    %c0_i32_1 = arith.constant 0 : i32
    return %c0_i32, %c0_i32_0 : i32, i32
  }
  func.func @transform_13(%arg0: i32) -> (i32, i32) {
    %c0_i32 = arith.constant 0 : i32
    %c0_i32_0 = arith.constant 0 : i32
    %c0_i32_1 = arith.constant 0 : i32
    return %c0_i32, %c0_i32_0 : i32, i32
  }
  func.func @transform_14(%arg0: i32) -> (i32, i32, i32) {
    %c0_i32 = arith.constant 0 : i32
    %c0_i32_0 = arith.constant 0 : i32
    %c0_i32_1 = arith.constant 0 : i32
    return %arg0, %c0_i32, %c0_i32_0 : i32, i32, i32
  }
}

module attributes {stable_mosaic.version = 11 : i64} {
  func.func @fused_block_kernel(%arg0: i32, %arg1: memref<1x8x32xf32, #tpu.memory_space<vmem>>, %arg2: memref<1x8x32xf32, #tpu.memory_space<vmem>>, %arg3: memref<1x32xf32, #tpu.memory_space<vmem>>, %arg4: memref<1x32xf32, #tpu.memory_space<vmem>>, %arg5: memref<1x1x8xf32, #tpu.memory_space<vmem>>, %arg6: memref<32x96xbf16, #tpu.memory_space<vmem>>, %arg7: memref<1x96xf32, #tpu.memory_space<vmem>>, %arg8: memref<32x32xbf16, #tpu.memory_space<vmem>>, %arg9: memref<1x32xf32, #tpu.memory_space<vmem>>, %arg10: memref<1x32xf32, #tpu.memory_space<vmem>>, %arg11: memref<1x32xf32, #tpu.memory_space<vmem>>, %arg12: memref<32x128xbf16, #tpu.memory_space<vmem>>, %arg13: memref<1x128xf32, #tpu.memory_space<vmem>>, %arg14: memref<128x32xbf16, #tpu.memory_space<vmem>>, %arg15: memref<1x32xf32, #tpu.memory_space<vmem>>, %arg16: memref<1x32xf32, #tpu.memory_space<vmem>>, %arg17: memref<1x32xf32, #tpu.memory_space<vmem>>, %arg18: memref<1x8x32xf32, #tpu.memory_space<vmem>>, %arg19: memref<8x32xf32, #tpu.memory_space<vmem>>) attributes {dimension_semantics = [#tpu.dimension_semantics<parallel>], iteration_bounds = array<i64: 2>, scalar_prefetch = 0 : i64, scratch_operands = 1 : i64, tpu.core_type = #tpu.core_type<tc>, window_params = [{transform_indices = @transform_0, window_bounds = array<i64: 1, 8, 32>}, {transform_indices = @transform_1, window_bounds = array<i64: 1, 8, 32>}, {pipeline_mode = #tpu.pipeline_mode<synchronous>, transform_indices = @transform_2, window_bounds = array<i64: 1, 32>}, {pipeline_mode = #tpu.pipeline_mode<synchronous>, transform_indices = @transform_3, window_bounds = array<i64: 1, 32>}, {transform_indices = @transform_4, window_bounds = array<i64: 1, 1, 8>}, {pipeline_mode = #tpu.pipeline_mode<synchronous>, transform_indices = @transform_5, window_bounds = array<i64: 32, 96>}, {pipeline_mode = #tpu.pipeline_mode<synchronous>, transform_indices = @transform_6, window_bounds = array<i64: 1, 96>}, {pipeline_mode = #tpu.pipeline_mode<synchronous>, transform_indices = @transform_7, window_bounds = array<i64: 32, 32>}, {pipeline_mode = #tpu.pipeline_mode<synchronous>, transform_indices = @transform_8, window_bounds = array<i64: 1, 32>}, {pipeline_mode = #tpu.pipeline_mode<synchronous>, transform_indices = @transform_9, window_bounds = array<i64: 1, 32>}, {pipeline_mode = #tpu.pipeline_mode<synchronous>, transform_indices = @transform_10, window_bounds = array<i64: 1, 32>}, {pipeline_mode = #tpu.pipeline_mode<synchronous>, transform_indices = @transform_11, window_bounds = array<i64: 32, 128>}, {pipeline_mode = #tpu.pipeline_mode<synchronous>, transform_indices = @transform_12, window_bounds = array<i64: 1, 128>}, {pipeline_mode = #tpu.pipeline_mode<synchronous>, transform_indices = @transform_13, window_bounds = array<i64: 128, 32>}, {pipeline_mode = #tpu.pipeline_mode<synchronous>, transform_indices = @transform_14, window_bounds = array<i64: 1, 32>}, {pipeline_mode = #tpu.pipeline_mode<synchronous>, transform_indices = @transform_15, window_bounds = array<i64: 1, 32>}, {pipeline_mode = #tpu.pipeline_mode<synchronous>, transform_indices = @transform_16, window_bounds = array<i64: 1, 32>}, {transform_indices = @transform_17, window_bounds = array<i64: 1, 8, 32>}]} {
    %c0 = arith.constant 0 : index
    %c0_0 = arith.constant 0 : index
    %c0_1 = arith.constant 0 : index
    %0 = vector.load %arg1[%c0, %c0_0, %c0_1] : memref<1x8x32xf32, #tpu.memory_space<vmem>>, vector<1x8x32xf32>
    %1 = vector.shape_cast %0 : vector<1x8x32xf32> to vector<8x32xf32>
    %c0_2 = arith.constant 0 : index
    %c0_3 = arith.constant 0 : index
    %c0_4 = arith.constant 0 : index
    %2 = vector.load %arg2[%c0_2, %c0_3, %c0_4] : memref<1x8x32xf32, #tpu.memory_space<vmem>>, vector<1x8x32xf32>
    %3 = vector.shape_cast %2 : vector<1x8x32xf32> to vector<8x32xf32>
    %4 = arith.addf %1, %3 : vector<8x32xf32>
    %cst = arith.constant dense<0.000000e+00> : vector<8xf32>
    %5 = vector.multi_reduction <add>, %4, %cst [1] : vector<8x32xf32> to vector<8xf32>
    %6 = vector.shape_cast %5 : vector<8xf32> to vector<8x1xf32>
    %cst_5 = arith.constant 3.200000e+01 : f32
    %7 = vector.broadcast %cst_5 : f32 to vector<8x1xf32>
    %8 = arith.divf %6, %7 : vector<8x1xf32>
    %9 = vector.broadcast %8 : vector<8x1xf32> to vector<8x32xf32>
    %10 = arith.subf %4, %9 : vector<8x32xf32>
    %11 = arith.mulf %10, %10 : vector<8x32xf32>
    %cst_6 = arith.constant dense<0.000000e+00> : vector<8xf32>
    %12 = vector.multi_reduction <add>, %11, %cst_6 [1] : vector<8x32xf32> to vector<8xf32>
    %13 = vector.shape_cast %12 : vector<8xf32> to vector<8x1xf32>
    %cst_7 = arith.constant 3.200000e+01 : f32
    %14 = vector.broadcast %cst_7 : f32 to vector<8x1xf32>
    %15 = arith.divf %13, %14 : vector<8x1xf32>
    %c0_8 = arith.constant 0 : index
    %c0_9 = arith.constant 0 : index
    %16 = vector.load %arg3[%c0_8, %c0_9] : memref<1x32xf32, #tpu.memory_space<vmem>>, vector<1x32xf32>
    %17 = vector.broadcast %8 : vector<8x1xf32> to vector<8x32xf32>
    %18 = arith.subf %4, %17 : vector<8x32xf32>
    %cst_10 = arith.constant 9.99999996E-13 : f32
    %19 = vector.broadcast %cst_10 : f32 to vector<8x1xf32>
    %20 = arith.addf %15, %19 : vector<8x1xf32>
    %21 = math.rsqrt %20 : vector<8x1xf32>
    %22 = vector.broadcast %21 : vector<8x1xf32> to vector<8x32xf32>
    %23 = arith.mulf %18, %22 : vector<8x32xf32>
    %24 = vector.broadcast %16 : vector<1x32xf32> to vector<8x32xf32>
    %25 = arith.mulf %24, %23 : vector<8x32xf32>
    %c0_11 = arith.constant 0 : index
    %c0_12 = arith.constant 0 : index
    %26 = vector.load %arg4[%c0_11, %c0_12] : memref<1x32xf32, #tpu.memory_space<vmem>>, vector<1x32xf32>
    %27 = vector.broadcast %26 : vector<1x32xf32> to vector<8x32xf32>
    %28 = arith.addf %25, %27 : vector<8x32xf32>
    %c0_13 = arith.constant 0 : index
    %c0_14 = arith.constant 0 : index
    %c0_15 = arith.constant 0 : index
    %29 = vector.load %arg5[%c0_13, %c0_14, %c0_15] : memref<1x1x8xf32, #tpu.memory_space<vmem>>, vector<1x1x8xf32>
    %30 = vector.shape_cast %29 : vector<1x1x8xf32> to vector<1x8xf32>
    %c0_16 = arith.constant 0 : index
    %c0_17 = arith.constant 0 : index
    %31 = vector.load %arg10[%c0_16, %c0_17] : memref<1x32xf32, #tpu.memory_space<vmem>>, vector<1x32xf32>
    %c0_18 = arith.constant 0 : index
    %c0_19 = arith.constant 0 : index
    %32 = vector.load %arg11[%c0_18, %c0_19] : memref<1x32xf32, #tpu.memory_space<vmem>>, vector<1x32xf32>
    %cst_20 = arith.constant dense<0.000000e+00> : vector<8xf32>
    %33 = vector.multi_reduction <add>, %28, %cst_20 [1] : vector<8x32xf32> to vector<8xf32>
    %34 = vector.shape_cast %33 : vector<8xf32> to vector<8x1xf32>
    %cst_21 = arith.constant 3.200000e+01 : f32
    %35 = vector.broadcast %cst_21 : f32 to vector<8x1xf32>
    %36 = arith.divf %34, %35 : vector<8x1xf32>
    %37 = vector.broadcast %36 : vector<8x1xf32> to vector<8x32xf32>
    %38 = arith.subf %28, %37 : vector<8x32xf32>
    %39 = arith.mulf %38, %38 : vector<8x32xf32>
    %cst_22 = arith.constant dense<0.000000e+00> : vector<8xf32>
    %40 = vector.multi_reduction <add>, %39, %cst_22 [1] : vector<8x32xf32> to vector<8xf32>
    %41 = vector.shape_cast %40 : vector<8xf32> to vector<8x1xf32>
    %cst_23 = arith.constant 0.0322580636 : f32
    %42 = vector.broadcast %cst_23 : f32 to vector<8x1xf32>
    %43 = arith.mulf %41, %42 : vector<8x1xf32>
    %44 = math.sqrt %43 : vector<8x1xf32>
    %cst_24 = arith.constant 9.99999997E-7 : f32
    %45 = vector.broadcast %cst_24 : f32 to vector<8x1xf32>
    %46 = arith.addf %44, %45 : vector<8x1xf32>
    %47 = tpu.reciprocal %46 {approx = true} : vector<8x1xf32> -> vector<8x1xf32>
    %48 = vector.broadcast %47 : vector<8x1xf32> to vector<8x32xf32>
    %49 = arith.mulf %38, %48 : vector<8x32xf32>
    %50 = vector.broadcast %31 : vector<1x32xf32> to vector<8x32xf32>
    %51 = arith.mulf %50, %49 : vector<8x32xf32>
    %52 = vector.broadcast %32 : vector<1x32xf32> to vector<8x32xf32>
    %53 = arith.addf %51, %52 : vector<8x32xf32>
    %54 = arith.truncf %53 : vector<8x32xf32> to vector<8x32xbf16>
    %c0_25 = arith.constant 0 : index
    %c0_26 = arith.constant 0 : index
    %55 = vector.load %arg6[%c0_25, %c0_26] : memref<32x96xbf16, #tpu.memory_space<vmem>>, vector<32x96xbf16>
    %cst_27 = arith.constant dense<0.000000e+00> : vector<8x96xf32>
    %56 = tpu.matmul %54, %55, %cst_27 {dimension_numbers = #tpu.dot_dimension_numbers<[1], [0], [0], [1], [0, 0, 1, 1], [], []>} : vector<8x32xbf16>, vector<32x96xbf16>, vector<8x96xf32> -> vector<8x96xf32>
    %c0_28 = arith.constant 0 : index
    %c0_29 = arith.constant 0 : index
    %57 = vector.load %arg7[%c0_28, %c0_29] : memref<1x96xf32, #tpu.memory_space<vmem>>, vector<1x96xf32>
    %58 = vector.broadcast %57 : vector<1x96xf32> to vector<8x96xf32>
    %59 = arith.addf %56, %58 : vector<8x96xf32>
    %60 = vector.extract_strided_slice %59 {offsets = [0, 0], sizes = [8, 32], strides = [1, 1]} : vector<8x96xf32> to vector<8x32xf32>
    %61 = arith.truncf %60 : vector<8x32xf32> to vector<8x32xbf16>
    %62 = vector.extract_strided_slice %59 {offsets = [0, 32], sizes = [8, 32], strides = [1, 1]} : vector<8x96xf32> to vector<8x32xf32>
    %63 = arith.truncf %62 : vector<8x32xf32> to vector<8x32xbf16>
    %64 = vector.extract_strided_slice %59 {offsets = [0, 64], sizes = [8, 32], strides = [1, 1]} : vector<8x96xf32> to vector<8x32xf32>
    %65 = arith.truncf %64 : vector<8x32xf32> to vector<8x32xbf16>
    %66 = vector.extract_strided_slice %61 {offsets = [0, 0], sizes = [8, 16], strides = [1, 1]} : vector<8x32xbf16> to vector<8x16xbf16>
    %67 = vector.extract_strided_slice %63 {offsets = [0, 0], sizes = [8, 16], strides = [1, 1]} : vector<8x32xbf16> to vector<8x16xbf16>
    %68 = vector.extract_strided_slice %65 {offsets = [0, 0], sizes = [8, 16], strides = [1, 1]} : vector<8x32xbf16> to vector<8x16xbf16>
    %cst_30 = arith.constant dense<0.000000e+00> : vector<8x8xf32>
    %69 = tpu.matmul %66, %67, %cst_30 {dimension_numbers = #tpu.dot_dimension_numbers<[1], [1], [0], [0], [0, 0, 1, 0], [], []>} : vector<8x16xbf16>, vector<8x16xbf16>, vector<8x8xf32> -> vector<8x8xf32>
    %70 = vector.broadcast %30 : vector<1x8xf32> to vector<8x8xf32>
    %71 = arith.addf %69, %70 : vector<8x8xf32>
    %cst_31 = arith.constant dense<0xFF800000> : vector<8xf32>
    %72 = vector.multi_reduction <maximumf>, %71, %cst_31 [1] : vector<8x8xf32> to vector<8xf32>
    %73 = vector.shape_cast %72 : vector<8xf32> to vector<8x1xf32>
    %74 = vector.broadcast %73 : vector<8x1xf32> to vector<8x8xf32>
    %75 = arith.subf %71, %74 : vector<8x8xf32>
    %76 = math.exp %75 : vector<8x8xf32>
    %cst_32 = arith.constant dense<0.000000e+00> : vector<8xf32>
    %77 = vector.multi_reduction <add>, %76, %cst_32 [1] : vector<8x8xf32> to vector<8xf32>
    %78 = vector.shape_cast %77 : vector<8xf32> to vector<8x1xf32>
    %79 = tpu.reciprocal %78 {approx = true} : vector<8x1xf32> -> vector<8x1xf32>
    %80 = vector.broadcast %79 : vector<8x1xf32> to vector<8x8xf32>
    %81 = arith.mulf %76, %80 : vector<8x8xf32>
    %82 = arith.truncf %81 : vector<8x8xf32> to vector<8x8xbf16>
    %cst_33 = arith.constant dense<0.000000e+00> : vector<8x16xf32>
    %83 = tpu.matmul %82, %68, %cst_33 {dimension_numbers = #tpu.dot_dimension_numbers<[1], [0], [0], [1], [0, 0, 1, 1], [], []>} : vector<8x8xbf16>, vector<8x16xbf16>, vector<8x16xf32> -> vector<8x16xf32>
    %c0_34 = arith.constant 0 : index
    %c0_35 = arith.constant 0 : index
    %84 = vector.load %arg19[%c0_34, %c0_35] : memref<8x32xf32, #tpu.memory_space<vmem>>, vector<8x16xf32>
    tpu.vector_store %arg19[%c0_34, %c0_35], %83 {strides = array<i32>} : memref<8x32xf32, #tpu.memory_space<vmem>>, vector<8x16xf32>,
    %85 = vector.extract_strided_slice %61 {offsets = [0, 16], sizes = [8, 16], strides = [1, 1]} : vector<8x32xbf16> to vector<8x16xbf16>
    %86 = vector.extract_strided_slice %63 {offsets = [0, 16], sizes = [8, 16], strides = [1, 1]} : vector<8x32xbf16> to vector<8x16xbf16>
    %87 = vector.extract_strided_slice %65 {offsets = [0, 16], sizes = [8, 16], strides = [1, 1]} : vector<8x32xbf16> to vector<8x16xbf16>
    %cst_36 = arith.constant dense<0.000000e+00> : vector<8x8xf32>
    %88 = tpu.matmul %85, %86, %cst_36 {dimension_numbers = #tpu.dot_dimension_numbers<[1], [1], [0], [0], [0, 0, 1, 0], [], []>} : vector<8x16xbf16>, vector<8x16xbf16>, vector<8x8xf32> -> vector<8x8xf32>
    %89 = vector.broadcast %30 : vector<1x8xf32> to vector<8x8xf32>
    %90 = arith.addf %88, %89 : vector<8x8xf32>
    %cst_37 = arith.constant dense<0xFF800000> : vector<8xf32>
    %91 = vector.multi_reduction <maximumf>, %90, %cst_37 [1] : vector<8x8xf32> to vector<8xf32>
    %92 = vector.shape_cast %91 : vector<8xf32> to vector<8x1xf32>
    %93 = vector.broadcast %92 : vector<8x1xf32> to vector<8x8xf32>
    %94 = arith.subf %90, %93 : vector<8x8xf32>
    %95 = math.exp %94 : vector<8x8xf32>
    %cst_38 = arith.constant dense<0.000000e+00> : vector<8xf32>
    %96 = vector.multi_reduction <add>, %95, %cst_38 [1] : vector<8x8xf32> to vector<8xf32>
    %97 = vector.shape_cast %96 : vector<8xf32> to vector<8x1xf32>
    %98 = tpu.reciprocal %97 {approx = true} : vector<8x1xf32> -> vector<8x1xf32>
    %99 = vector.broadcast %98 : vector<8x1xf32> to vector<8x8xf32>
    %100 = arith.mulf %95, %99 : vector<8x8xf32>
    %101 = arith.truncf %100 : vector<8x8xf32> to vector<8x8xbf16>
    %cst_39 = arith.constant dense<0.000000e+00> : vector<8x16xf32>
    %102 = tpu.matmul %101, %87, %cst_39 {dimension_numbers = #tpu.dot_dimension_numbers<[1], [0], [0], [1], [0, 0, 1, 1], [], []>} : vector<8x8xbf16>, vector<8x16xbf16>, vector<8x16xf32> -> vector<8x16xf32>
    %c0_40 = arith.constant 0 : index
    %c16 = arith.constant 16 : index
    %103 = vector.load %arg19[%c0_40, %c16] : memref<8x32xf32, #tpu.memory_space<vmem>>, vector<8x16xf32>
    tpu.vector_store %arg19[%c0_40, %c16], %102 {strides = array<i32>} : memref<8x32xf32, #tpu.memory_space<vmem>>, vector<8x16xf32>,
    %c0_41 = arith.constant 0 : index
    %c0_42 = arith.constant 0 : index
    %104 = vector.load %arg19[%c0_41, %c0_42] : memref<8x32xf32, #tpu.memory_space<vmem>>, vector<8x32xf32>
    %105 = arith.truncf %104 : vector<8x32xf32> to vector<8x32xbf16>
    %c0_43 = arith.constant 0 : index
    %c0_44 = arith.constant 0 : index
    %106 = vector.load %arg8[%c0_43, %c0_44] : memref<32x32xbf16, #tpu.memory_space<vmem>>, vector<32x32xbf16>
    %cst_45 = arith.constant dense<0.000000e+00> : vector<8x32xf32>
    %107 = tpu.matmul %105, %106, %cst_45 {dimension_numbers = #tpu.dot_dimension_numbers<[1], [0], [0], [1], [0, 0, 1, 1], [], []>} : vector<8x32xbf16>, vector<32x32xbf16>, vector<8x32xf32> -> vector<8x32xf32>
    %c0_46 = arith.constant 0 : index
    %c0_47 = arith.constant 0 : index
    %108 = vector.load %arg9[%c0_46, %c0_47] : memref<1x32xf32, #tpu.memory_space<vmem>>, vector<1x32xf32>
    %109 = vector.broadcast %108 : vector<1x32xf32> to vector<8x32xf32>
    %110 = arith.addf %107, %109 : vector<8x32xf32>
    %111 = arith.addf %28, %110 : vector<8x32xf32>
    %c0_48 = arith.constant 0 : index
    %c0_49 = arith.constant 0 : index
    %112 = vector.load %arg16[%c0_48, %c0_49] : memref<1x32xf32, #tpu.memory_space<vmem>>, vector<1x32xf32>
    %c0_50 = arith.constant 0 : index
    %c0_51 = arith.constant 0 : index
    %113 = vector.load %arg17[%c0_50, %c0_51] : memref<1x32xf32, #tpu.memory_space<vmem>>, vector<1x32xf32>
    %cst_52 = arith.constant dense<0.000000e+00> : vector<8xf32>
    %114 = vector.multi_reduction <add>, %111, %cst_52 [1] : vector<8x32xf32> to vector<8xf32>
    %115 = vector.shape_cast %114 : vector<8xf32> to vector<8x1xf32>
    %cst_53 = arith.constant 3.200000e+01 : f32
    %116 = vector.broadcast %cst_53 : f32 to vector<8x1xf32>
    %117 = arith.divf %115, %116 : vector<8x1xf32>
    %118 = vector.broadcast %117 : vector<8x1xf32> to vector<8x32xf32>
    %119 = arith.subf %111, %118 : vector<8x32xf32>
    %120 = arith.mulf %119, %119 : vector<8x32xf32>
    %cst_54 = arith.constant dense<0.000000e+00> : vector<8xf32>
    %121 = vector.multi_reduction <add>, %120, %cst_54 [1] : vector<8x32xf32> to vector<8xf32>
    %122 = vector.shape_cast %121 : vector<8xf32> to vector<8x1xf32>
    %cst_55 = arith.constant 0.0322580636 : f32
    %123 = vector.broadcast %cst_55 : f32 to vector<8x1xf32>
    %124 = arith.mulf %122, %123 : vector<8x1xf32>
    %125 = math.sqrt %124 : vector<8x1xf32>
    %cst_56 = arith.constant 9.99999997E-7 : f32
    %126 = vector.broadcast %cst_56 : f32 to vector<8x1xf32>
    %127 = arith.addf %125, %126 : vector<8x1xf32>
    %128 = tpu.reciprocal %127 {approx = true} : vector<8x1xf32> -> vector<8x1xf32>
    %129 = vector.broadcast %128 : vector<8x1xf32> to vector<8x32xf32>
    %130 = arith.mulf %119, %129 : vector<8x32xf32>
    %131 = vector.broadcast %112 : vector<1x32xf32> to vector<8x32xf32>
    %132 = arith.mulf %131, %130 : vector<8x32xf32>
    %133 = vector.broadcast %113 : vector<1x32xf32> to vector<8x32xf32>
    %134 = arith.addf %132, %133 : vector<8x32xf32>
    %135 = arith.truncf %134 : vector<8x32xf32> to vector<8x32xbf16>
    %c0_57 = arith.constant 0 : index
    %c0_58 = arith.constant 0 : index
    %136 = vector.load %arg12[%c0_57, %c0_58] : memref<32x128xbf16, #tpu.memory_space<vmem>>, vector<32x128xbf16>
    %cst_59 = arith.constant dense<0.000000e+00> : vector<8x128xf32>
    %137 = tpu.matmul %135, %136, %cst_59 {dimension_numbers = #tpu.dot_dimension_numbers<[1], [0], [0], [1], [0, 0, 1, 1], [], []>} : vector<8x32xbf16>, vector<32x128xbf16>, vector<8x128xf32> -> vector<8x128xf32>
    %c0_60 = arith.constant 0 : index
    %c0_61 = arith.constant 0 : index
    %138 = vector.load %arg13[%c0_60, %c0_61] : memref<1x128xf32, #tpu.memory_space<vmem>>, vector<1x128xf32>
    %139 = vector.broadcast %138 : vector<1x128xf32> to vector<8x128xf32>
    %140 = arith.addf %137, %139 : vector<8x128xf32>
    %cst_62 = arith.constant 5.000000e-01 : f32
    %141 = vector.broadcast %cst_62 : f32 to vector<8x128xf32>
    %142 = arith.mulf %141, %140 : vector<8x128xf32>
    %143 = arith.mulf %140, %140 : vector<8x128xf32>
    %144 = arith.mulf %143, %140 : vector<8x128xf32>
    %cst_63 = arith.constant 4.471500e-02 : f32
    %145 = vector.broadcast %cst_63 : f32 to vector<8x128xf32>
    %146 = arith.mulf %145, %144 : vector<8x128xf32>
    %147 = arith.addf %140, %146 : vector<8x128xf32>
    %cst_64 = arith.constant 0.797884583 : f32
    %148 = vector.broadcast %cst_64 : f32 to vector<8x128xf32>
    %149 = arith.mulf %148, %147 : vector<8x128xf32>
    %150 = math.tanh %149 : vector<8x128xf32>
    %cst_65 = arith.constant 1.000000e+00 : f32
    %151 = vector.broadcast %cst_65 : f32 to vector<8x128xf32>
    %152 = arith.addf %151, %150 : vector<8x128xf32>
    %153 = arith.mulf %142, %152 : vector<8x128xf32>
    %154 = arith.truncf %153 : vector<8x128xf32> to vector<8x128xbf16>
    %c0_66 = arith.constant 0 : index
    %c0_67 = arith.constant 0 : index
    %155 = vector.load %arg14[%c0_66, %c0_67] : memref<128x32xbf16, #tpu.memory_space<vmem>>, vector<128x32xbf16>
    %cst_68 = arith.constant dense<0.000000e+00> : vector<8x32xf32>
    %156 = tpu.matmul %154, %155, %cst_68 {dimension_numbers = #tpu.dot_dimension_numbers<[1], [0], [0], [1], [0, 0, 1, 1], [], []>} : vector<8x128xbf16>, vector<128x32xbf16>, vector<8x32xf32> -> vector<8x32xf32>
    %c0_69 = arith.constant 0 : index
    %c0_70 = arith.constant 0 : index
    %157 = vector.load %arg15[%c0_69, %c0_70] : memref<1x32xf32, #tpu.memory_space<vmem>>, vector<1x32xf32>
    %158 = vector.broadcast %157 : vector<1x32xf32> to vector<8x32xf32>
    %159 = arith.addf %156, %158 : vector<8x32xf32>
    %160 = arith.addf %111, %159 : vector<8x32xf32>
    %c0_71 = arith.constant 0 : index
    %c0_72 = arith.constant 0 : index
    %c0_73 = arith.constant 0 : index
    %161 = vector.load %arg18[%c0_71, %c0_72, %c0_73] : memref<1x8x32xf32, #tpu.memory_space<vmem>>, vector<1x8x32xf32>
    %162 = vector.shape_cast %161 : vector<1x8x32xf32> to vector<8x32xf32>
    %163 = vector.shape_cast %160 : vector<8x32xf32> to vector<1x8x32xf32>
    tpu.vector_store %arg18[%c0_71, %c0_72, %c0_73], %163 {strides = array<i32>} : memref<1x8x32xf32, #tpu.memory_space<vmem>>, vector<1x8x32xf32>,
    return
  }
  func.func @transform_0(%arg0: i32) -> (i32, i32, i32) {
    %c0_i32 = arith.constant 0 : i32
    %c0_i32_0 = arith.constant 0 : i32
    %c0_i32_1 = arith.constant 0 : i32
    return %arg0, %c0_i32, %c0_i32_0 : i32, i32, i32
  }
  func.func @transform_1(%arg0: i32) -> (i32, i32, i32) {
    %c0_i32 = arith.constant 0 : i32
    %c0_i32_0 = arith.constant 0 : i32
    %c0_i32_1 = arith.constant 0 : i32
    return %arg0, %c0_i32, %c0_i32_0 : i32, i32, i32
  }
  func.func @transform_2(%arg0: i32) -> (i32, i32) {
    %c0_i32 = arith.constant 0 : i32
    %c0_i32_0 = arith.constant 0 : i32
    %c0_i32_1 = arith.constant 0 : i32
    return %c0_i32, %c0_i32_0 : i32, i32
  }
  func.func @transform_3(%arg0: i32) -> (i32, i32) {
    %c0_i32 = arith.constant 0 : i32
    %c0_i32_0 = arith.constant 0 : i32
    %c0_i32_1 = arith.constant 0 : i32
    return %c0_i32, %c0_i32_0 : i32, i32
  }
  func.func @transform_4(%arg0: i32) -> (i32, i32, i32) {
    %c0_i32 = arith.constant 0 : i32
    %c0_i32_0 = arith.constant 0 : i32
    %c0_i32_1 = arith.constant 0 : i32
    return %arg0, %c0_i32, %c0_i32_0 : i32, i32, i32
  }
  func.func @transform_5(%arg0: i32) -> (i32, i32) {
    %c0_i32 = arith.constant 0 : i32
    %c0_i32_0 = arith.constant 0 : i32
    %c0_i32_1 = arith.constant 0 : i32
    return %c0_i32, %c0_i32_0 : i32, i32
  }
  func.func @transform_6(%arg0: i32) -> (i32, i32) {
    %c0_i32 = arith.constant 0 : i32
    %c0_i32_0 = arith.constant 0 : i32
    %c0_i32_1 = arith.constant 0 : i32
    return %c0_i32, %c0_i32_0 : i32, i32
  }
  func.func @transform_7(%arg0: i32) -> (i32, i32) {
    %c0_i32 = arith.constant 0 : i32
    %c0_i32_0 = arith.constant 0 : i32
    %c0_i32_1 = arith.constant 0 : i32
    return %c0_i32, %c0_i32_0 : i32, i32
  }
  func.func @transform_8(%arg0: i32) -> (i32, i32) {
    %c0_i32 = arith.constant 0 : i32
    %c0_i32_0 = arith.constant 0 : i32
    %c0_i32_1 = arith.constant 0 : i32
    return %c0_i32, %c0_i32_0 : i32, i32
  }
  func.func @transform_9(%arg0: i32) -> (i32, i32) {
    %c0_i32 = arith.constant 0 : i32
    %c0_i32_0 = arith.constant 0 : i32
    %c0_i32_1 = arith.constant 0 : i32
    return %c0_i32, %c0_i32_0 : i32, i32
  }
  func.func @transform_10(%arg0: i32) -> (i32, i32) {
    %c0_i32 = arith.constant 0 : i32
    %c0_i32_0 = arith.constant 0 : i32
    %c0_i32_1 = arith.constant 0 : i32
    return %c0_i32, %c0_i32_0 : i32, i32
  }
  func.func @transform_11(%arg0: i32) -> (i32, i32) {
    %c0_i32 = arith.constant 0 : i32
    %c0_i32_0 = arith.constant 0 : i32
    %c0_i32_1 = arith.constant 0 : i32
    return %c0_i32, %c0_i32_0 : i32, i32
  }
  func.func @transform_12(%arg0: i32) -> (i32, i32) {
    %c0_i32 = arith.constant 0 : i32
    %c0_i32_0 = arith.constant 0 : i32
    %c0_i32_1 = arith.constant 0 : i32
    return %c0_i32, %c0_i32_0 : i32, i32
  }
  func.func @transform_13(%arg0: i32) -> (i32, i32) {
    %c0_i32 = arith.constant 0 : i32
    %c0_i32_0 = arith.constant 0 : i32
    %c0_i32_1 = arith.constant 0 : i32
    return %c0_i32, %c0_i32_0 : i32, i32
  }
  func.func @transform_14(%arg0: i32) -> (i32, i32) {
    %c0_i32 = arith.constant 0 : i32
    %c0_i32_0 = arith.constant 0 : i32
    %c0_i32_1 = arith.constant 0 : i32
    return %c0_i32, %c0_i32_0 : i32, i32
  }
  func.func @transform_15(%arg0: i32) -> (i32, i32) {
    %c0_i32 = arith.constant 0 : i32
    %c0_i32_0 = arith.constant 0 : i32
    %c0_i32_1 = arith.constant 0 : i32
    return %c0_i32, %c0_i32_0 : i32, i32
  }
  func.func @transform_16(%arg0: i32) -> (i32, i32) {
    %c0_i32 = arith.constant 0 : i32
    %c0_i32_0 = arith.constant 0 : i32
    %c0_i32_1 = arith.constant 0 : i32
    return %c0_i32, %c0_i32_0 : i32, i32
  }
  func.func @transform_17(%arg0: i32) -> (i32, i32, i32) {
    %c0_i32 = arith.constant 0 : i32
    %c0_i32_0 = arith.constant 0 : i32
    %c0_i32_1 = arith.constant 0 : i32
    return %arg0, %c0_i32, %c0_i32_0 : i32, i32, i32
  }
}

</mosaic_0001>

<bundles_post_ra>
// kernel: reverse.0
= control target key start
LH: loop header
LB: loop body
LE: loop exit
PB: predicated region body
PF: predicated region fallthrough
CT: control target
= control target key end

     0   :  { %v55_v2 = vld [vmem:[#allocation1 + $0x8] sm:$0xf]  ;;  %v62_v3 = vld [vmem:[#allocation1] sm:$0xf]  ;;  %v72_v6 = vlaneseq  ;;  %s177_s0 = inlined_call_operand.vmem [shape: f32[2,32,3], index: 0, kind: input, shape index: {}]   ;;  %s178_s1 = inlined_call_operand.vmem [shape: f32[2,32,3], index: 1, kind: output, shape index: {}]  }
   0x1   :  { %v18_v0 = vld [vmem:[%s177_s0] sm:$0xf]  ;;  %v20_v1 = vld [vmem:[%s177_s0 + $0x4] sm:$0xf]  ;;  %57 = vst [vmem:[#allocation0 + $0x10] sm:$0xf] %v55_v2 }
   0x2   :  { %19 = vst [vmem:[#allocation1 + $0x4] sm:$0xf] %v18_v0  ;;  %21 = vst [vmem:[#allocation1 + $0xc] sm:$0xf] %v20_v1  ;;  %v73_v11 = vshrl.u32 %v72_v6, 7 }
   0x3   :  { %63 = vst [vmem:[#allocation0] sm:$0xf] %v62_v3 }
   0x4   :  { %vm74_vm0 = vcmp.lt.s32.totalorder %v73_v11, 3 }
   0x8   :  { %v79_v7 = vld [vmem:[#allocation0 + $0x17] ss:$-1 sm:$0xff] }
   0x9   :  { %v50_v4 = vld [vmem:[#allocation1 + $0xc] sm:$0xf]  ;;  %v59_v5 = vld [vmem:[#allocation1 + $0x4] sm:$0xf]  ;;  %v80_v9 = vrot.slane %v79_v7, 5 }
   0xa   :  { %52 = vst [vmem:[#allocation0 + $0x18] sm:$0xf] %v50_v4  ;;  %61 = vst [vmem:[#allocation0 + $0x8] sm:$0xf] %v59_v5  ;;  %v65_v8 = vld [vmem:[#allocation0 + $0x7] ss:$-1 sm:$0xff] }
   0xb   :  { %v66_v10 = vrot.slane %v65_v8, 5  ;;  %81 = vst [vmem:[#allocation2 + $0x8] sm:$0xff] %v80_v9 }
   0xd   :  { %67 = vst [vmem:[#allocation2] sm:$0xff] %v66_v10 }
  0x11   :  { %v70_v12 = vld [vmem:[#allocation0 + $0xf] ss:$-1 sm:$0xff]  ;;  %v84_v13 = vld [vmem:[#allocation0 + $0x1f] ss:$-1 sm:$0xff] }
  0x12   :  { %v71_v14 = vrot.slane %v70_v12, 5  ;;  %v85_v15 = vrot.slane %v84_v13, 5 }
  0x14   :  { %75 = vst.msk [vmem:[#allocation2] sm:$0xff] %vm74_vm0, %v71_v14  ;;  %89 = vst.msk [vmem:[#allocation2 + $0x8] sm:$0xff] %vm74_vm0, %v85_v15 }
  0x1b   :  { %v93_v16 = vld [vmem:[#allocation2] sm:$0xf]  ;;  %v97_v17 = vld [vmem:[#allocation2 + $0x8] sm:$0xf] }
  0x1c   :  { %95 = vst [vmem:[#allocation3] sm:$0xf] %v93_v16  ;;  %100 = vst [vmem:[#allocation3 + $0x4] sm:$0xf] %v97_v17 }
  0x23   :  { %v116_v18 = vld [vmem:[#allocation3] sm:$0xff]  }
  0x24   :  { %117 = vst [vmem:[%s178_s1] sm:$0xff] %v116_v18  }

// kernel: bert_forward.3
= control target key start
LH: loop header
LB: loop body
LE: loop exit
PB: predicated region body
PF: predicated region fallthrough
CT: control target
= control target key end

     0   :  { %s1795_s0 = inlined_call_operand.vmem [shape: f32[2,8,32], index: 0, kind: input, shape index: {}]   ;;  %s1796_s1 = inlined_call_operand.vmem [shape: f32[2,1,8], index: 1, kind: input, shape index: {}]   ;;  %s1797_s2 = inlined_call_operand.vmem [shape: bf16[32,96], index: 2, kind: input, shape index: {}]   ;;  %s1798_s3 = inlined_call_operand.vmem [shape: f32[1,96], index: 3, kind: input, shape index: {}]   ;;  %s1799_s4 = inlined_call_operand.vmem [shape: bf16[32,32], index: 4, kind: input, shape index: {}]   ;;  %s1800_s5 = inlined_call_operand.vmem [shape: f32[1,32], index: 5, kind: input, shape index: {}]   ;;  %s1801_s6 = inlined_call_operand.vmem [shape: f32[1,32], index: 6, kind: input, shape index: {}]   ;;  %s1802_s7 = inlined_call_operand.vmem [shape: f32[1,32], index: 7, kind: input, shape index: {}]   ;;  %s1803_s8 = inlined_call_operand.vmem [shape: bf16[32,128], index: 8, kind: input, shape index: {}]   ;;  %s1804_s9 = inlined_call_operand.vmem [shape: f32[1,128], index: 9, kind: input, shape index: {}]   ;;  %s1805_s10 = inlined_call_operand.vmem [shape: bf16[128,32], index: 10, kind: input, shape index: {}]   ;;  %s1806_s11 = inlined_call_operand.vmem [shape: f32[1,32], index: 11, kind: input, shape index: {}]   ;;  %s1807_s12 = inlined_call_operand.vmem [shape: f32[1,32], index: 12, kind: input, shape index: {}]   ;;  %s1808_s13 = inlined_call_operand.vmem [shape: f32[1,32], index: 13, kind: input, shape index: {}]   ;;  %s1809_s14 = inlined_call_operand.hbm [shape: f32[2,8,32], index: 14, kind: output, shape index: {}]  }
   0x1   :  { %1810 = sst [smem:[#allocation6_spill]] %s1795_s0 }
   0x2   :  { %1811 = sst [smem:[#allocation7_spill]] %s1796_s1 }
   0x3   :  { %1812 = sst [smem:[#allocation8_spill]] %s1797_s2 }
   0x4   :  { %1813 = sst [smem:[#allocation9_spill]] %s1798_s3 }
   0x5   :  { %19 = vsyncpa [#allocation4], 0 }
   0x6   :  { %21 = vsyncpa [#allocation4 + $0x1], 0  ;;  %s1559_s29 = smov 0   ;;  %s1561_s30 = smov 0  }
   0x7   :  { %s1563_s15 = smov 0   ;;  %s1565_s16 = smov 0  }
   0x8 LB: > { %s1580_s17 = sadd.s32 4294967295, %s1473_s16   ;;  %s1198_s18 = sadd.s32 4294967294, %s1473_s16   ;;  %s1473_s16 = sphi %s1565_s16, %s1823_s16   ;;  %s1469_s15 = sphi %s1563_s15, %s1822_s15   ;;  %s1465_s30 = sphi %s1561_s30, %s1821_s30   ;;  %s1461_s29 = sphi %s1559_s29, %s1820_s29  }
   0x9   : > { %s1584_s19 = sadd.s32 1, %s1473_s16   ;;  %s338_s20 = sadd.s32 1, %s1469_s15 }
   0xa   : > { %s335_s21 = ssub.s32 %s1473_s16, %s1584_s19  ;;  %p348_p0 = scmp.ne.s32.totalorder %s1469_s15, %s1465_s30 }
   0xb   : > { %p336_p1 = scmp.eq.s32.totalorder %s335_s21, 0  ;;  %p349_p2 = scmp.eq.s32.totalorder %s1580_s17, 1 }
   0xc   : > { %p354_p3 = scmp.ne.s32.totalorder %s1465_s30, %s1461_s29  ;;  %p355_p4 = scmp.eq.s32.totalorder %s1198_s18, 1 }
   0xd   : > { %s1595_s22 = scalar_select %p336_p1, %s1469_s15, %s338_s20  }
   0xe   : > { %p1597_p5 = por %p349_p2, %p348_p0  ;;  %p1601_p6 = por %p355_p4, %p354_p3 }
   0xf   : > { %p1201_p7 = scmp.ge.s32.totalorder %s1473_s16, 1  ;;  %p422_p8 = scmp.lt.s32.totalorder %s1473_s16, 3 }
  0x11   : > { %p423_p9 = pnand %p1201_p7, %p422_p8 }
  0x12   : > { %p470_p10 = scmp.lt.s32.totalorder (!%p423_p9), %s1580_s17, 1  ;;  %vm482_vm0 = vcmask (!%p423_p9), 261120   ;;  %s1816_s0 = sld [smem:[#allocation6_spill]] (!%p423_p9)  ;;  %v1475_v8 = vmov (!%p423_p9), 0.0   ;;  %vm1476_vm1 = vmmov (!%p423_p9), 0   ;;  %vm595_vm4 = vcmask (!%p423_p9), 130048  }
  0x13   : > { %426 = sbr.rel (%p423_p9) target bundleno = 2592 (0xa20), region = 76  ;;  %s1817_s2 = sld [smem:[#allocation8_spill]] (!%p423_p9)  ;;  %1264 = vmatprep.subr.bf16.mxu0 (!%p423_p9), %v1475_v8  ;;  %1268 = vmatprep.mubr.msk.bf16.mxu0 (!%p423_p9), %vm1476_vm1, %v1475_v8  ;;  %v1204_v19 = vld [vmem:[%s1801_s6] ss:$0 sm:$0xff] (!%p423_p9)  ;;  %vm642_vm5 = vcmask (!%p423_p9), 64512   ;;  %vm660_vm6 = vcmask (!%p423_p9), 1043456  }
  0x14   : > { %1284 = vmatprep.subr.bf16.mxu1 (!%p423_p9), %v1475_v8  ;;  %1286 = vmatprep.mubr.msk.bf16.mxu1 (!%p423_p9), %vm1476_vm1, %v1475_v8  ;;  %v1205_v21 = vld [vmem:[%s1802_s7] ss:$0 sm:$0xff] (!%p423_p9)  ;;  %s1818_s3 = sld [smem:[#allocation9_spill]] (!%p423_p9)  ;;  %s1477_s28 = smov (!%p423_p9), 112   ;;  %vm819_vm7 = vcmask (!%p423_p9), 261248  }
  0x15   : > { %s1479_s20 = smov (!%p423_p9), 80   ;;  %s1819_s1 = sld [smem:[#allocation7_spill]] (!%p423_p9) }
  0x19   : > { %v1379_v7 = vld [vmem:[%s1817_s2] sm:$0xff] (!%p423_p9)   ;;  %v1380_v9 = vld [vmem:[%s1817_s2 + $0x8] sm:$0xff] (!%p423_p9)  }
  0x1a   : > { %s1609_s25 = scalar_select %p470_p10, %s1580_s17, 1  ;;  %1265 = vmatpush3.bf16.msra.mxu0 %v1379_v7  ;;  %v1206_v25 = vld [vmem:[%s1818_s3] ss:$0 sm:$0xff] }
  0x1b   : > { %1266 = vmatprep.subr.bf16.mxu0 %v1475_v8 }
  0x1c   : > { %s1203_s26 = sshll.u32 %s1609_s25, 3  ;;  %s476_s27 = scalar_lea.vmem %s1819_s1, %s1609_s25 }
  0x1d   : > { %s473_s18 = scalar_lea.vmem %s1816_s0, %s1203_s26  ;;  %v1210_v37 = vld [vmem:[%s476_s27] ss:$0 sm:$0xff]  ;;  %s1481_s25 = smov 64  }
  0x1e   : > { %v1615_v0 = vld [vmem:[%s473_s18] sm:$0xff]  ;;  %1267 = vmatpush3.bf16.msra.mxu0 %v1380_v9  ;;  %s1478_s18 = smov 96   ;;  %s1482_s27 = smov 16  }
  0x1f   : > { %v483_v1 = vsel %vm482_vm0, %v1615_v0, 0.0  ;;  %1272 = vmatprep.subr.bf16.mxu0 %v1475_v8  ;;  %s467_s26 = sand.u32 1, %s1465_s30  }
  0x20   : > { %484 = vadd.xlane.f32.xlu0 %v483_v1 }
  0xad   : > { %v485_v2 = vpop.xlane.xlu0 %484 }
  0xae   : > { %v487_v3 = vmul.f32 0.03125, %v485_v2 }
  0xb0   : > { %v488_v4 = vsub.f32 %v1615_v0, %v487_v3 }
  0xb2   : > { %v489_v5 = vmul.f32 %v488_v4, %v488_v4 }
  0xb4   : > { %v490_v6 = vsel %vm482_vm0, %v489_v5, 0.0 }
  0xb5   : > { %491 = vadd.xlane.f32.xlu0 %v490_v6 }
 0x142   : > { %v492_v10 = vpop.xlane.xlu0 %491 }
 0x143   : > { %v493_v11 = vmul.f32 0.032258064, %v492_v10  ;;  %v1381_v10 = vld [vmem:[%s1799_s4] sm:$0xff]  }
 0x145   : > { %1393 = vrsqrt.f32 %v493_v11  ;;  %vm496_vm2 = vcmp.eq.f32.partialorder %v493_v11, inf  ;;  %v499_v14 = vand.u32 2147483648, %v493_v11  ;;  %vm498_vm3 = vcmp.eq.f32.partialorder %v493_v11, 0.0 }
 0x14f   : > { %v1394_v12 = vpop.eup %1393 }
 0x150   : > { %v495_v13 = vmul.f32 %v1394_v12, %v493_v11 }
 0x152   : > { %v497_v15 = vsel %vm496_vm2, %v493_v11, %v495_v13  ;;  %v1382_v11 = vld [vmem:[%s1799_s4 + $0x8] sm:$0xff]  }
 0x153   : > { %v500_v16 = vsel %vm498_vm3, %v499_v14, %v497_v15 }
 0x154   : > { %v501_v17 = vadd.f32 1e-06, %v500_v16 }
 0x156   : > { %1395 = vrcp.f32 %v501_v17 }
 0x160   : > { %v1396_v18 = vpop.eup %1395 }
 0x161   : > { %v503_v20 = vmul.f32 %v1396_v18, %v488_v4 }
 0x163   : > { %v510_v22 = vmul.f32 %v1204_v19, %v503_v20 }
 0x165   : > { %v517_v23 = vadd.f32 %v1205_v21, %v510_v22 }
 0x167   : > { %v518_v24 = vpack.c.bf16 %v517_v23, %v517_v23  ;;  %v1215_v23 = vld [vmem:[%s1800_s5] ss:$0 sm:$0xff] }
 0x169   : > { %1269 = vmatmul.mubr.msk.bf16.vlgmr.msra.gmra.mrb[0].mxu0 %vm482_vm0, %v518_v24 }
 0x16a   : > { %1274 = vmatprep.mubr.msk.bf16.mxu0 %vm1476_vm1, %v1475_v8 }
 0x23c   : > { %v579_v26 = vpop.f32.mrb[0].mxu0 }
 0x23d   : > { %v580_v27 = vadd.f32 %v1206_v25, %v579_v26  ;;  %v1270_v28 = vpop.f32.mrb[1].mxu0 }
 0x23e   : > { %v582_v29 = vpop.f32.mrb[2].mxu0 }
 0x23f   : > { %v585_v30 = vpack.c.bf16 %v580_v27, %v580_v27  ;;  %v1271_v31 = vpop.f32.mrb[3].mxu0 }
 0x241   : > { %705 = vrot.lane.b32.xlu0 %v585_v30, %s1477_s28  ;;  %593 = vrot.lane.b32.xlu1 %v585_v30, %s1478_s18  ;;  %s1480_s28 = smov 48   ;;  %s1235_s18 = sshll.u32 %s1580_s17, 7 }
 0x242   : > { %s1752_s2 = scalar_lea.hbm %s1809_s14, %s1235_s18  ;;  %s1117_s17 = scalar_lea.sflag [#allocation4], %s467_s26 }
 0x245   : > { %707 = vrot.lane.b32.xlu1 %v585_v30, %s1479_s20 }
 0x2b3   : > { %v594_v32 = vpop.permute.xlu1 %593  ;;  %v706_v36 = vpop.permute.xlu0 %705 }
 0x2b4   : > { %v600_v33 = vsel %vm595_vm4, %v594_v32, 0 }
 0x2b5   : > { %1273 = vmatpush3.bf16.xpose.msra.mxu0 %v600_v33 }
 0x2b6   : > { %1278 = vmatprep.subr.bf16.mxu0 %v1475_v8 }
 0x2b7   : > { %v708_v34 = vpop.permute.xlu1 %707 }
 0x2b8   : > { %v713_v35 = vsel %vm595_vm4, %v708_v34, 0 }
 0x2b9   : > { %1285 = vmatpush3.bf16.xpose.msra.mxu1 %v713_v35 }
 0x2ba   : > { %1296 = vmatprep.subr.bf16.mxu1 %v1475_v8 }
 0x2bc   : > { %1275 = vmatmul.mubr.msk.bf16.vlgmr.msra.gmra.mrb[4].mxu0 %vm595_vm4, %v585_v30 }
 0x2bd   : > { %1280 = vmatprep.mubr.msk.bf16.mxu0 %vm1476_vm1, %v1475_v8 }
 0x2c0   : > { %1287 = vmatmul.mubr.msk.bf16.vlgmr.msra.gmra.mrb[0].mxu1 %vm595_vm4, %v706_v36  ;;  %v1383_v36 = vld [vmem:[%s1803_s8] sm:$0xff]  }
 0x2c1   : > { %1300 = vmatprep.mubr.msk.bf16.mxu1 %vm1476_vm1, %v1475_v8  ;;  %1297 = vmatpush3.bf16.msra.mxu1 %v1381_v10 }
 0x2c2   : > { %1298 = vmatprep.subr.bf16.mxu1 %v1475_v8 }
 0x2c5   : > { %1299 = vmatpush3.bf16.msra.mxu1 %v1382_v11 }
 0x2c6   : > { %1312 = vmatprep.subr.bf16.mxu1 %v1475_v8 }
 0x38f   : > { %v636_v38 = vpop.f32.mrb[4].mxu0 }
 0x390   : > { %v637_v39 = vadd.f32 %v1210_v37, %v636_v38  ;;  %v1276_v40 = vpop.f32.mrb[5].mxu0 }
 0x391   : > { %v639_v41 = vpop.f32.mrb[6].mxu0 }
 0x392   : > { %v1277_v42 = vpop.f32.mrb[7].mxu0  ;;  %v643_v43 = vsel %vm642_vm5, %v637_v39, -inf }
 0x393   : > { %v749_v44 = vpop.f32.mrb[0].mxu1  ;;  %644 = vmax.xlane.f32.xlu1 %v643_v43 }
 0x394   : > { %v750_v45 = vadd.f32 %v1210_v37, %v749_v44  ;;  %v1288_v46 = vpop.f32.mrb[1].mxu1  ;;  %v1385_v37 = vld [vmem:[%s1805_s10] sm:$0xff]  }
 0x395   : > { %v752_v47 = vpop.f32.mrb[2].mxu1 }
 0x396   : > { %v1289_v48 = vpop.f32.mrb[3].mxu1  ;;  %v755_v49 = vsel %vm642_vm5, %v750_v45, -inf  ;;  %v1219_v47 = vld [vmem:[%s1807_s12] ss:$0 sm:$0xff] }
 0x397   : > { %756 = vmax.xlane.f32.xlu0 %v755_v49  ;;  %v1220_v49 = vld [vmem:[%s1808_s13] ss:$0 sm:$0xff] }
 0x3ad   : > { %767 = vrot.lane.b32.xlu0 %v585_v30, %s1480_s28  ;;  %s1483_s28 = smov [#allocation3]  }
 0x420   : > { %v645_v50 = vpop.xlane.xlu1 %644 }
 0x421   : > { %v646_v51 = vsub.f32 %v637_v39, %v645_v50 }
 0x423   : > { %v647_v52 = vmul.f32 1.442695, %v646_v51 }
 0x424   : > { %v757_v53 = vpop.xlane.xlu0 %756 }
 0x425   : > { %1397 = vpow2.f32 %v647_v52  ;;  %v758_v54 = vsub.f32 %v750_v45, %v757_v53  ;;  %v1386_v53 = vld [vmem:[%s1805_s10 + $0x8] sm:$0xff]  }
 0x427   : > { %v759_v55 = vmul.f32 1.442695, %v758_v54  ;;  %v1387_v54 = vld [vmem:[%s1805_s10 + $0x10] sm:$0xff]  }
 0x428   : > { %v768_v3 = vpop.permute.xlu0 %767 }
 0x429   : > { %1399 = vpow2.f32 %v759_v55  ;;  %v773_v6 = vsel %vm660_vm6, %v768_v3, 0  ;;  %v1388_v55 = vld [vmem:[%s1805_s10 + $0x18] sm:$0xff]  }
 0x42f   : > { %v1398_v56 = vpop.eup %1397 }
 0x430   : > { %v649_v57 = vsel %vm642_vm5, %v1398_v56, 0.0 }
 0x431   : > { %650 = vadd.xlane.f32.xlu1 %v649_v57  ;;  %v1390_v57 = vld [vmem:[%s1805_s10 + $0x28] sm:$0xff]  }
 0x433   : > { %v1400_v58 = vpop.eup %1399 }
 0x434   : > { %v761_v59 = vsel %vm642_vm5, %v1400_v58, 0.0 }
 0x435   : > { %762 = vadd.xlane.f32.xlu1 %v761_v59  ;;  %v1392_v59 = vld [vmem:[%s1805_s10 + $0x38] sm:$0xff]  }
 0x446   : > { %655 = vrot.lane.b32.xlu1 %v585_v30, %s1481_s25  ;;  %s1415_s25 = sshll.u32 %s1483_s28, 4  ;;  %s1416_s25 = int_to_ptr.vmem [resolvable:$false] %s1415_s25 }
 0x447   : > { %s1417_s3 = scalar_lea.vmem %s1416_s25, 256 }
 0x4be   : > { %v651_v60 = vpop.xlane.xlu1 %650 }
 0x4bf   : > { %1401 = vrcp.f32 %v651_v60  ;;  %v1221_v60 = vld [vmem:[%s1804_s9] ss:$0 sm:$0xff] }
 0x4c2   : > { %v763_v61 = vpop.xlane.xlu1 %762 }
 0x4c3   : > { %1403 = vrcp.f32 %v763_v61 }
 0x4c6   : > { %v656_v62 = vpop.permute.xlu1 %655 }
 0x4c7   : > { %v662_v63 = vsel %vm660_vm6, %v656_v62, 0 }
 0x4c8   : > { %1279 = vmatpush3.bf16.msra.mxu0 %v662_v63 }
 0x4c9   : > { %v1402_v1 = vpop.eup %1401  ;;  %1290 = vmatprep.subr.bf16.mxu0 %v1475_v8 }
 0x4ca   : > { %v653_v2 = vmul.f32 %v1402_v1, %v1398_v56  ;;  %v1389_v56 = vld [vmem:[%s1805_s10 + $0x20] sm:$0xff]  }
 0x4cc   : > { %v654_v4 = vpack.c.bf16 %v653_v2, %v653_v2 }
 0x4cd   : > { %v1404_v5 = vpop.eup %1403 }
 0x4ce   : > { %1281 = vmatmul.mubr.msk.bf16.vlgmr.msra.gmra.mrb[8].mxu0 %vm642_vm5, %v654_v4  ;;  %v765_v7 = vmul.f32 %v1404_v5, %v1400_v58  ;;  %v1391_v58 = vld [vmem:[%s1805_s10 + $0x30] sm:$0xff]  }
 0x4cf   : > { %1291 = vmatpush3.bf16.msra.mxu0 %v773_v6  ;;  %1292 = vmatprep.mubr.msk.bf16.mxu0 %vm1476_vm1, %v1475_v8 }
 0x4d0   : > { %1304 = vmatprep.subr.bf16.mxu0 %v1475_v8  ;;  %v766_v9 = vpack.c.bf16 %v765_v7, %v765_v7 }
 0x4d6   : > { %1293 = vmatmul.mubr.msk.bf16.vlgmr.msra.gmra.mrb[12].mxu0 %vm642_vm5, %v766_v9 }
 0x4d7   : > { %1308 = vmatprep.mubr.msk.bf16.mxu0 %vm1476_vm1, %v1475_v8  ;;  %1305 = vmatpush3.bf16.msra.mxu0 %v1383_v36 }
 0x4d8   : > { %1306 = vmatprep.subr.bf16.mxu0 %v1475_v8 }
 0x5a1   : > { %v698_v12 = vpop.f32.mrb[8].mxu0 }
 0x5a2   : > { %704 = vst.msk [vmem:[#allocation2] sm:$0xff] %vm595_vm4, %v698_v12  ;;  %v1282_v13 = vpop.f32.mrb[9].mxu0 }
 0x5a3   : > { %v701_v14 = vpop.f32.mrb[10].mxu0  ;;  %v1225_v13 = vld [vmem:[%s1806_s11] ss:$0 sm:$0xff] }
 0x5a4   : > { %v1283_v15 = vpop.f32.mrb[11].mxu0 }
 0x5a9   : > { %v809_v16 = vpop.f32.mrb[12].mxu0 }
 0x5aa   : > { %816 = vrot.lane.b32.xlu1 %v809_v16, %s1482_s27  ;;  %v1294_v17 = vpop.f32.mrb[13].mxu0  ;;  %s1202_s27 = sshll.u32 %s467_s26, 3 }
 0x5ab   : > { %v812_v18 = vpop.f32.mrb[14].mxu0  ;;  %s469_s20 = scalar_lea.vmem [#allocation3], %s1202_s27 }
 0x5ac   : > { %v1295_v19 = vpop.f32.mrb[15].mxu0  ;;  %s1130_s21 = sshll.u32 %s469_s20, 4  ;;  %s1754_s21 = int_to_ptr.vmem [resolvable:$true] %s1130_s21 }
 0x5ad   : > { %s1411_s27 = scalar_lea.vmem %s1754_s21, 128  ;;  %p1418_p0 = scmp.lt.s32.totalorder %s1754_s21, %s1416_s25 }
 0x5ae   : > { %p1412_p11 = scmp.ne.s32.totalorder %s1754_s21, %s1411_s27  ;;  %p1419_p1 = scmp.lt.s32.totalorder %s1417_s3, %s1411_s27 }
 0x5b0   : > { %p1413_p12 = pnand %p1412_p11, %p1597_p5  ;;  %p1420_p2 = por %p1419_p1, %p1418_p0 }
 0x5b2   : > { %p1414_p13 = pneg %p1413_p12 }
 0x5b4   : > { %p1421_p3 = pnand %p1420_p2, %p1414_p13 }
 0x61c   : > { %v817_v20 = vpop.permute.xlu1 %816 }
 0x61d   : > { %820 = vst.msk [vmem:[#allocation2] sm:$0xff] %vm819_vm7, %v817_v20 }
 0x624   : > { %v821_v21 = vld [vmem:[#allocation2] sm:$0xff] }
 0x625   : > { %v822_v22 = vpack.c.bf16 %v821_v21, %v821_v21 }
 0x627   : > { %1301 = vmatmul.mubr.msk.bf16.vlgmr.msra.gmra.mrb[4].mxu1 %vm482_vm0, %v822_v22 }
 0x628   : > { %1328 = vmatprep.mubr.msk.bf16.mxu1 %vm1476_vm1, %v1475_v8  ;;  %1313 = vmatpush3.bf16.msra.mxu1 %v1385_v37 }
 0x629   : > { %1314 = vmatprep.subr.bf16.mxu1 %v1475_v8 }
 0x62c   : > { %1315 = vmatpush3.bf16.msra.mxu1 %v1386_v53 }
 0x62d   : > { %1316 = vmatprep.subr.bf16.mxu1 %v1475_v8 }
 0x630   : > { %1317 = vmatpush3.bf16.msra.mxu1 %v1387_v54 }
 0x631   : > { %1318 = vmatprep.subr.bf16.mxu1 %v1475_v8 }
 0x634   : > { %1319 = vmatpush3.bf16.msra.mxu1 %v1388_v55 }
 0x635   : > { %1320 = vmatprep.subr.bf16.mxu1 %v1475_v8 }
 0x638   : > { %1321 = vmatpush3.bf16.msra.mxu1 %v1389_v56 }
 0x639   : > { %1322 = vmatprep.subr.bf16.mxu1 %v1475_v8 }
 0x63c   : > { %1323 = vmatpush3.bf16.msra.mxu1 %v1390_v57 }
 0x63d   : > { %1324 = vmatprep.subr.bf16.mxu1 %v1475_v8 }
 0x640   : > { %1325 = vmatpush3.bf16.msra.mxu1 %v1391_v58 }
 0x641   : > { %1326 = vmatprep.subr.bf16.mxu1 %v1475_v8 }
 0x644   : > { %1327 = vmatpush3.bf16.msra.mxu1 %v1392_v59 }
 0x6fa   : > { %v883_v24 = vpop.f32.mrb[4].mxu1 }
 0x6fb   : > { %v884_v25 = vadd.f32 %v1215_v23, %v883_v24  ;;  %v1302_v26 = vpop.f32.mrb[5].mxu1 }
 0x6fc   : > { %v886_v27 = vpop.f32.mrb[6].mxu1 }
 0x6fd   : > { %v1689_v28 = vadd.f32 %v884_v25, %v1615_v0  ;;  %v1303_v29 = vpop.f32.mrb[7].mxu1  ;;  %v1384_v0 = vld [vmem:[%s1803_s8 + $0x8] sm:$0xff]  }
 0x6fe   : > { %1307 = vmatpush3.bf16.msra.mxu0 %v1384_v0 }
 0x6ff   : > { %v892_v30 = vsel %vm482_vm0, %v1689_v28, 0.0 }
 0x700   : > { %893 = vadd.xlane.f32.xlu1 %v892_v30 }
 0x78d   : > { %v894_v31 = vpop.xlane.xlu1 %893 }
 0x78e   : > { %v895_v32 = vmul.f32 0.03125, %v894_v31 }
 0x790   : > { %v896_v33 = vsub.f32 %v1689_v28, %v895_v32 }
 0x792   : > { %v897_v34 = vmul.f32 %v896_v33, %v896_v33 }
 0x794   : > { %v898_v35 = vsel %vm482_vm0, %v897_v34, 0.0 }
 0x795   : > { %899 = vadd.xlane.f32.xlu0 %v898_v35 }
 0x822   : > { %v900_v38 = vpop.xlane.xlu0 %899 }
 0x823   : > { %v901_v39 = vmul.f32 0.032258064, %v900_v38 }
 0x825   : > { %1405 = vrsqrt.f32 %v901_v39  ;;  %vm904_vm8 = vcmp.eq.f32.partialorder %v901_v39, inf  ;;  %v907_v42 = vand.u32 2147483648, %v901_v39  ;;  %vm906_vm9 = vcmp.eq.f32.partialorder %v901_v39, 0.0 }
 0x82f   : > { %v1406_v40 = vpop.eup %1405 }
 0x830   : > { %v903_v41 = vmul.f32 %v1406_v40, %v901_v39 }
 0x832   : > { %v905_v43 = vsel %vm904_vm8, %v901_v39, %v903_v41 }
 0x833   : > { %v908_v44 = vsel %vm906_vm9, %v907_v42, %v905_v43 }
 0x834   : > { %v909_v45 = vadd.f32 1e-06, %v908_v44 }
 0x836   : > { %1407 = vrcp.f32 %v909_v45 }
 0x840   : > { %v1408_v46 = vpop.eup %1407 }
 0x841   : > { %v911_v48 = vmul.f32 %v1408_v46, %v896_v33 }
 0x843   : > { %v918_v50 = vmul.f32 %v1219_v47, %v911_v48 }
 0x845   : > { %v925_v51 = vadd.f32 %v1220_v49, %v918_v50 }
 0x847   : > { %v926_v52 = vpack.c.bf16 %v925_v51, %v925_v51 }
 0x849   : > { %1309 = vmatmul.mubr.msk.bf16.vlgmr.msra.gmra.mrb[16].mxu0 %vm482_vm0, %v926_v52 }
 0x91c   : > { %v987_v61 = vpop.f32.mrb[16].mxu0 }
 0x91d   : > { %v988_v62 = vadd.f32 %v1221_v60, %v987_v61  ;;  %v1310_v63 = vpop.f32.mrb[17].mxu0 }
 0x91e   : > { %v990_v1 = vpop.f32.mrb[18].mxu0 }
 0x91f   : > { %v994_v2 = vmul.f32 %v988_v62, %v988_v62  ;;  %v1311_v3 = vpop.f32.mrb[19].mxu0  ;;  %v993_v8 = vmul.f32 0.5, %v988_v62 }
 0x921   : > { %v995_v4 = vmul.f32 %v994_v2, %v988_v62 }
 0x923   : > { %v996_v5 = vmul.f32 0.044715, %v995_v4 }
 0x925   : > { %v997_v6 = vadd.f32 %v996_v5, %v988_v62 }
 0x927   : > { %v998_v7 = vmul.f32 0.7978846, %v997_v6 }
 0x929   : > { %1409 = vtanh.f32 %v998_v7 }
 0x933   : > { %v1410_v9 = vpop.eup %1409 }
 0x934   : > { %v1000_v10 = vadd.f32 1.0, %v1410_v9 }
 0x936   : > { %v1001_v11 = vmul.f32 %v1000_v10, %v993_v8 }
 0x938   : > { %v1002_v12 = vpack.c.bf16 %v1001_v11, %v1001_v11 }
 0x93a   : > { %1329 = vmatmul.mubr.bf16.vlgmr.msra.gmra.mrb[8].mxu1 %v1002_v12 }
 0xa0d   : > { %v1108_v14 = vpop.f32.mrb[8].mxu1 }
 0xa0e   : > { %v1109_v15 = vadd.f32 %v1225_v13, %v1108_v14  ;;  %v1330_v16 = vpop.f32.mrb[9].mxu1 }
 0xa0f   : > { %v1111_v17 = vpop.f32.mrb[10].mxu1 }
 0xa10   : > { %v1114_v18 = vadd.f32 %v1109_v15, %v1689_v28  ;;  %v1331_v19 = vpop.f32.mrb[11].mxu1 }
 0xa12   : > { %1115 = vst.msk [vmem:[%s469_s20] sm:$0xff] %vm482_vm0, %v1114_v18 }
 0xa13   : > { %1424 = shalt.err (!%p1421_p3)
}
 0xa14   : > { %s1425_s1 = scalar_lea.hbm %s1752_s2, 128  ;;  %s1429_s20 = scalar_lea.hbm %s1809_s14, 256 }
 0xa15   : > { %p1426_p4 = scmp.ne.s32.totalorder %s1752_s2, %s1425_s1  ;;  %p1430_p9 = scmp.lt.u32.totalorder %s1752_s2, %s1809_s14 }
 0xa16   : > { %p1431_p10 = scmp.lt.u32.totalorder %s1429_s20, %s1425_s1  ;;  %p1433_p12 = scmp.lt.u32.totalorder %s1425_s1, %s1752_s2 }
 0xa17   : > { %p1427_p7 = pnand %p1426_p4, %p1597_p5 }
 0xa18   : > { %p1432_p11 = por %p1431_p10, %p1430_p9 }
 0xa19   : > { %p1428_p8 = pneg %p1427_p7 }
 0xa1a   : > { %p1434_p13 = por %p1433_p12, %p1432_p11 }
 0xa1c   : > { %p1435_p0 = pnand %p1434_p13, %p1428_p8 }
 0xa1e   : > { %1438 = shalt.err (!%p1435_p0)
}
 0xa1f   : > { %1332 = dma.vmem_to_hbm [thread:$0]  (%p1597_p5), %s1754_s21, 128, %s1752_s2, %s1117_s17  }
 0xa20 PF: > { %p1338_p1 = scmp.ge.s32.totalorder %s1473_s16, 2  ;;  %s1142_s3 = sand.u32 1, %s1461_s29  }
 0xa21   : > { %s1143_s27 = scalar_lea.sflag [#allocation4], %s1142_s3 }
 0xa22   : > { %p1335_p2 = pnand %p1338_p1, %p1601_p6 }
 0xa24   : > { %1456 = dma.done.wait (!%p1335_p2), %s1143_s27, 128  }
 0xa25   : > { %1458 = vsyncadd (!%p1335_p2), %s1143_s27, 4294967168  ;;  %p24_p3 = scmp.ge.s32.totalorder %s1584_s19, 4   ;;  %s1820_s29 = smov %s1465_s30 }
 0xa26   : > { %s1821_s30 = smov %s1469_s15  ;;  %s1822_s15 = smov %s1595_s22 }
 0xa27   : > { %s1823_s16 = smov %s1584_s19  ;;  %26 = sbr.rel (!%p24_p3) target bundleno = 8 (0x8), region = 114 }
 0xa2e   :  { %1148 = vsyncpa [#allocation4], 1 }
 0xa2f   :  { %1150 = vsyncpa [#allocation4 + $0x1], 1 }

// kernel: bert_forward.2
= control target key start
LH: loop header
LB: loop body
LE: loop exit
PB: predicated region body
PF: predicated region fallthrough
CT: control target
= control target key end

     0   :  { %s1611_s24 = smov 0   ;;  %s1782_s0 = inlined_call_operand.vmem [shape: f32[2,8,32], index: 0, kind: input, shape index: {}]   ;;  %s1783_s1 = inlined_call_operand.vmem [shape: f32[2,8,32], index: 1, kind: input, shape index: {}]   ;;  %s1784_s2 = inlined_call_operand.vmem [shape: f32[1,32], index: 2, kind: input, shape index: {}]   ;;  %s1785_s3 = inlined_call_operand.vmem [shape: f32[1,32], index: 3, kind: input, shape index: {}]   ;;  %s1786_s4 = inlined_call_operand.vmem [shape: f32[2,1,8], index: 4, kind: input, shape index: {}]   ;;  %s1787_s5 = inlined_call_operand.vmem [shape: bf16[32,96], index: 5, kind: input, shape index: {}]   ;;  %s1788_s6 = inlined_call_operand.vmem [shape: f32[1,96], index: 6, kind: input, shape index: {}]   ;;  %s1789_s7 = inlined_call_operand.vmem [shape: bf16[32,32], index: 7, kind: input, shape index: {}]   ;;  %s1790_s8 = inlined_call_operand.vmem [shape: f32[1,32], index: 8, kind: input, shape index: {}]   ;;  %s1791_s9 = inlined_call_operand.vmem [shape: f32[1,32], index: 9, kind: input, shape index: {}]   ;;  %s1792_s10 = inlined_call_operand.vmem [shape: f32[1,32], index: 10, kind: input, shape index: {}]   ;;  %s1793_s11 = inlined_call_operand.vmem [shape: bf16[32,128], index: 11, kind: input, shape index: {}]   ;;  %s1794_s12 = inlined_call_operand.vmem [shape: f32[1,128], index: 12, kind: input, shape index: {}]   ;;  %s1795_s13 = inlined_call_operand.vmem [shape: bf16[128,32], index: 13, kind: input, shape index: {}]   ;;  %s1796_s14 = inlined_call_operand.vmem [shape: f32[1,32], index: 14, kind: input, shape index: {}]   ;;  %s1797_s15 = inlined_call_operand.vmem [shape: f32[1,32], index: 15, kind: input, shape index: {}]   ;;  %s1798_s16 = inlined_call_operand.vmem [shape: f32[1,32], index: 16, kind: input, shape index: {}]   ;;  %s1799_s17 = inlined_call_operand.vmem [shape: f32[2,8,32], index: 17, kind: output, shape index: {}]  }
   0x1   :  { %1800 = sst [smem:[#allocation3_spill]] %s1782_s0 }
   0x2   :  { %1801 = sst [smem:[#allocation4_spill]] %s1783_s1 }
   0x3 LB: > { %s1319_s25 = sadd.s32 4294967295, %s1511_s24   ;;  %p1323_p0 = scmp.ge.s32.totalorder %s1511_s24, 1  ;;  %s1511_s24 = sphi %s1611_s24, %s27_s24  }
   0x4   : > { %p503_p1 = scmp.lt.s32.totalorder %s1511_s24, 3 }
   0x6   : > { %p504_p2 = pnand %p1323_p0, %p503_p1 }
   0x7   : > { %p560_p3 = scmp.lt.s32.totalorder (!%p504_p2), %s1319_s25, 1  ;;  %s1802_s29 = sld [smem:[#allocation3_spill]] (!%p504_p2)  ;;  %vm579_vm0 = vcmask (!%p504_p2), 261120   ;;  %v1327_v13 = vld [vmem:[%s1784_s2] ss:$0 sm:$0xff] (!%p504_p2)  ;;  %v1513_v25 = vmov (!%p504_p2), 0.0  }
   0x8   : > { %507 = sbr.rel (%p504_p2) target bundleno = 2883 (0xb43), region = 88  ;;  %s1803_s19 = sld [smem:[#allocation4_spill]] (!%p504_p2)  ;;  %v1328_v15 = vld [vmem:[%s1785_s3] ss:$0 sm:$0xff] (!%p504_p2)  ;;  %1387 = vmatprep.subr.bf16.mxu0 (!%p504_p2), %v1513_v25  ;;  %vm1514_vm1 = vmmov (!%p504_p2), 0   ;;  %v1472_v26 = vld [vmem:[%s1787_s5 + $0x8] sm:$0xff] (!%p504_p2)   ;;  %1407 = vmatprep.subr.bf16.mxu1 (!%p504_p2), %v1513_v25 }
   0x9   : > { %v1471_v24 = vld [vmem:[%s1787_s5] sm:$0xff] (!%p504_p2)   ;;  %1391 = vmatprep.mubr.msk.bf16.mxu0 (!%p504_p2), %vm1514_vm1, %v1513_v25  ;;  %1409 = vmatprep.mubr.msk.bf16.mxu1 (!%p504_p2), %vm1514_vm1, %v1513_v25  ;;  %s1515_s22 = smov (!%p504_p2), 80   ;;  %s1516_s23 = smov (!%p504_p2), 96   ;;  %vm724_vm4 = vcmask (!%p504_p2), 130048   ;;  %vm771_vm5 = vcmask (!%p504_p2), 64512   ;;  %vm789_vm6 = vcmask (!%p504_p2), 1043456  }
   0xa   : > { %1388 = vmatpush3.bf16.msra.mxu0 (!%p504_p2), %v1471_v24  ;;  %v1329_v36 = vld [vmem:[%s1791_s9] ss:$0 sm:$0xff] (!%p504_p2)  ;;  %s1517_s27 = smov (!%p504_p2), 112   ;;  %s1518_s30 = smov (!%p504_p2), 64   ;;  %vm948_vm7 = vcmask (!%p504_p2), 261248  }
   0xb   : > { %1389 = vmatprep.subr.bf16.mxu0 (!%p504_p2), %v1513_v25  ;;  %v1330_v38 = vld [vmem:[%s1792_s10] ss:$0 sm:$0xff] (!%p504_p2)  ;;  %s1520_s21 = smov (!%p504_p2), 16  }
   0xc   : > { %v1331_v42 = vld [vmem:[%s1788_s6] ss:$0 sm:$0xff] (!%p504_p2) }
   0xe   : > { %1390 = vmatpush3.bf16.msra.mxu0 (!%p504_p2), %v1472_v26 }
   0xf   : > { %s1805_s25 = smov (!%p560_p3, %s1319_s25), 1  ;;  %1395 = vmatprep.subr.bf16.mxu0 %v1513_v25 }
  0x10   : > { %s1622_s26 = sshll.u32 %s1805_s25, 3 }
  0x11   : > { %s563_s0 = scalar_lea.vmem %s1802_s29, %s1622_s26  ;;  %s567_s1 = scalar_lea.vmem %s1803_s19, %s1622_s26 }
  0x12   : > { %v576_v0 = vld [vmem:[%s563_s0] sm:$0xff]  ;;  %s570_s0 = scalar_lea.vmem %s1786_s4, %s1805_s25  ;;  %s1519_s25 = smov 48  }
  0x13   : > { %v577_v1 = vld [vmem:[%s567_s1] sm:$0xff] }
  0x14   : > { %v578_v2 = vadd.f32 %v577_v1, %v576_v0  ;;  %v1335_v54 = vld [vmem:[%s570_s0] ss:$0 sm:$0xff] }
  0x16   : > { %v580_v3 = vsel %vm579_vm0, %v578_v2, 0.0 }
  0x17   : > { %581 = vadd.xlane.f32.xlu0 %v580_v3 }
  0xa4   : > { %v582_v4 = vpop.xlane.xlu0 %581 }
  0xa5   : > { %v584_v5 = vmul.f32 0.03125, %v582_v4 }
  0xa7   : > { %v585_v6 = vsub.f32 %v578_v2, %v584_v5 }
  0xa9   : > { %v586_v7 = vmul.f32 %v585_v6, %v585_v6 }
  0xab   : > { %v587_v8 = vsel %vm579_vm0, %v586_v7, 0.0 }
  0xac   : > { %588 = vadd.xlane.f32.xlu0 %v587_v8 }
 0x139   : > { %v589_v9 = vpop.xlane.xlu0 %588 }
 0x13a   : > { %v590_v10 = vmul.f32 0.03125, %v589_v9 }
 0x13c   : > { %v592_v11 = vadd.f32 1e-12, %v590_v10 }
 0x13e   : > { %1485 = vrsqrt.f32 %v592_v11 }
 0x148   : > { %v1486_v12 = vpop.eup %1485 }
 0x149   : > { %v594_v14 = vmul.f32 %v1486_v12, %v585_v6 }
 0x14b   : > { %v601_v16 = vmul.f32 %v1327_v13, %v594_v14 }
 0x14d   : > { %v1640_v17 = vadd.f32 %v1328_v15, %v601_v16 }
 0x14f   : > { %v613_v18 = vsel %vm579_vm0, %v1640_v17, 0.0 }
 0x150   : > { %614 = vadd.xlane.f32.xlu1 %v613_v18 }
 0x1dd   : > { %v615_v19 = vpop.xlane.xlu1 %614 }
 0x1de   : > { %v616_v20 = vmul.f32 0.03125, %v615_v19 }
 0x1e0   : > { %v617_v21 = vsub.f32 %v1640_v17, %v616_v20 }
 0x1e2   : > { %v618_v22 = vmul.f32 %v617_v21, %v617_v21 }
 0x1e4   : > { %v619_v23 = vsel %vm579_vm0, %v618_v22, 0.0 }
 0x1e5   : > { %620 = vadd.xlane.f32.xlu1 %v619_v23 }
 0x272   : > { %v621_v27 = vpop.xlane.xlu1 %620 }
 0x273   : > { %v622_v28 = vmul.f32 0.032258064, %v621_v27  ;;  %v1473_v27 = vld [vmem:[%s1789_s7] sm:$0xff]  }
 0x275   : > { %1487 = vrsqrt.f32 %v622_v28  ;;  %vm625_vm2 = vcmp.eq.f32.partialorder %v622_v28, inf  ;;  %v628_v31 = vand.u32 2147483648, %v622_v28  ;;  %vm627_vm3 = vcmp.eq.f32.partialorder %v622_v28, 0.0 }
 0x27f   : > { %v1488_v29 = vpop.eup %1487 }
 0x280   : > { %v624_v30 = vmul.f32 %v1488_v29, %v622_v28 }
 0x282   : > { %v626_v32 = vsel %vm625_vm2, %v622_v28, %v624_v30  ;;  %v1474_v28 = vld [vmem:[%s1789_s7 + $0x8] sm:$0xff]  }
 0x283   : > { %v629_v33 = vsel %vm627_vm3, %v628_v31, %v626_v32 }
 0x284   : > { %v630_v34 = vadd.f32 1e-06, %v629_v33 }
 0x286   : > { %1489 = vrcp.f32 %v630_v34 }
 0x290   : > { %v1490_v35 = vpop.eup %1489 }
 0x291   : > { %v632_v37 = vmul.f32 %v1490_v35, %v617_v21 }
 0x293   : > { %v639_v39 = vmul.f32 %v1329_v36, %v632_v37 }
 0x295   : > { %v646_v40 = vadd.f32 %v1330_v38, %v639_v39 }
 0x297   : > { %v647_v41 = vpack.c.bf16 %v646_v40, %v646_v40  ;;  %v1340_v40 = vld [vmem:[%s1790_s8] ss:$0 sm:$0xff] }
 0x299   : > { %1392 = vmatmul.mubr.msk.bf16.vlgmr.msra.gmra.mrb[0].mxu0 %vm579_vm0, %v647_v41 }
 0x29a   : > { %1397 = vmatprep.mubr.msk.bf16.mxu0 %vm1514_vm1, %v1513_v25 }
 0x36c   : > { %v708_v43 = vpop.f32.mrb[0].mxu0 }
 0x36d   : > { %v709_v44 = vadd.f32 %v1331_v42, %v708_v43  ;;  %v1393_v45 = vpop.f32.mrb[1].mxu0 }
 0x36e   : > { %v711_v46 = vpop.f32.mrb[2].mxu0 }
 0x36f   : > { %v714_v47 = vpack.c.bf16 %v709_v44, %v709_v44  ;;  %v1394_v48 = vpop.f32.mrb[3].mxu0 }
 0x371   : > { %836 = vrot.lane.b32.xlu1 %v714_v47, %s1515_s22  ;;  %722 = vrot.lane.b32.xlu0 %v714_v47, %s1516_s23 }
 0x375   : > { %834 = vrot.lane.b32.xlu1 %v714_v47, %s1517_s27 }
 0x3e3   : > { %v837_v49 = vpop.permute.xlu1 %836  ;;  %v723_v50 = vpop.permute.xlu0 %722 }
 0x3e4   : > { %v729_v51 = vsel %vm724_vm4, %v723_v50, 0  ;;  %v842_v52 = vsel %vm724_vm4, %v837_v49, 0 }
 0x3e5   : > { %1396 = vmatpush3.bf16.xpose.msra.mxu0 %v729_v51  ;;  %1408 = vmatpush3.bf16.xpose.msra.mxu1 %v842_v52 }
 0x3e6   : > { %1401 = vmatprep.subr.bf16.mxu0 %v1513_v25  ;;  %1419 = vmatprep.subr.bf16.mxu1 %v1513_v25 }
 0x3e7   : > { %v835_v53 = vpop.permute.xlu1 %834 }
 0x3ec   : > { %1398 = vmatmul.mubr.msk.bf16.vlgmr.msra.gmra.mrb[4].mxu0 %vm724_vm4, %v714_v47  ;;  %1410 = vmatmul.mubr.msk.bf16.vlgmr.msra.gmra.mrb[0].mxu1 %vm724_vm4, %v835_v53  ;;  %v1475_v53 = vld [vmem:[%s1793_s11] sm:$0xff]  }
 0x3ed   : > { %1403 = vmatprep.mubr.msk.bf16.mxu0 %vm1514_vm1, %v1513_v25  ;;  %1423 = vmatprep.mubr.msk.bf16.mxu1 %vm1514_vm1, %v1513_v25 }
 0x3ee   : > { %1420 = vmatpush3.bf16.msra.mxu1 %v1473_v27 }
 0x3ef   : > { %1421 = vmatprep.subr.bf16.mxu1 %v1513_v25 }
 0x3f2   : > { %1422 = vmatpush3.bf16.msra.mxu1 %v1474_v28 }
 0x3f3   : > { %1435 = vmatprep.subr.bf16.mxu1 %v1513_v25 }
 0x4bf   : > { %v765_v55 = vpop.f32.mrb[4].mxu0  ;;  %v878_v56 = vpop.f32.mrb[0].mxu1 }
 0x4c0   : > { %v766_v57 = vadd.f32 %v1335_v54, %v765_v55  ;;  %v879_v58 = vadd.f32 %v1335_v54, %v878_v56  ;;  %v1399_v59 = vpop.f32.mrb[5].mxu0  ;;  %v1411_v60 = vpop.f32.mrb[1].mxu1  ;;  %v1477_v54 = vld [vmem:[%s1795_s13] sm:$0xff]  }
 0x4c1   : > { %v768_v61 = vpop.f32.mrb[6].mxu0  ;;  %v881_v62 = vpop.f32.mrb[2].mxu1 }
 0x4c2   : > { %v1400_v63 = vpop.f32.mrb[7].mxu0  ;;  %v1412_v0 = vpop.f32.mrb[3].mxu1  ;;  %v884_v1 = vsel %vm771_vm5, %v879_v58, -inf  ;;  %v772_v2 = vsel %vm771_vm5, %v766_v57, -inf }
 0x4c3   : > { %885 = vmax.xlane.f32.xlu0 %v884_v1  ;;  %773 = vmax.xlane.f32.xlu1 %v772_v2  ;;  %v1344_v0 = vld [vmem:[%s1797_s15] ss:$0 sm:$0xff] }
 0x4c4   : > { %v1345_v2 = vld [vmem:[%s1798_s16] ss:$0 sm:$0xff] }
 0x4d4   : > { %784 = vrot.lane.b32.xlu1 %v714_v47, %s1518_s30  ;;  %s574_s30 = scalar_lea.vmem %s1799_s17, %s1622_s26 }
 0x550   : > { %v886_v3 = vpop.xlane.xlu0 %885  ;;  %v774_v4 = vpop.xlane.xlu1 %773 }
 0x551   : > { %v887_v5 = vsub.f32 %v879_v58, %v886_v3  ;;  %v775_v6 = vsub.f32 %v766_v57, %v774_v4 }
 0x553   : > { %v776_v7 = vmul.f32 1.442695, %v775_v6  ;;  %v888_v8 = vmul.f32 1.442695, %v887_v5  ;;  %v1478_v6 = vld [vmem:[%s1795_s13 + $0x8] sm:$0xff]  }
 0x554   : > { %v785_v9 = vpop.permute.xlu1 %784 }
 0x555   : > { %v791_v10 = vsel %vm789_vm6, %v785_v9, 0  ;;  %1491 = vpow2.f32 %v776_v7  ;;  %v1479_v7 = vld [vmem:[%s1795_s13 + $0x10] sm:$0xff]   ;;  %v1481_v9 = vld [vmem:[%s1795_s13 + $0x20] sm:$0xff]  }
 0x556   : > { %1402 = vmatpush3.bf16.msra.mxu0 %v791_v10  ;;  %1493 = vpow2.f32 %v888_v8  ;;  %v1480_v8 = vld [vmem:[%s1795_s13 + $0x18] sm:$0xff]   ;;  %v1482_v10 = vld [vmem:[%s1795_s13 + $0x28] sm:$0xff]  }
 0x557   : > { %1413 = vmatprep.subr.bf16.mxu0 %v1513_v25 }
 0x55f   : > { %v1492_v11 = vpop.eup %1491 }
 0x560   : > { %v778_v12 = vsel %vm771_vm5, %v1492_v11, 0.0  ;;  %v1494_v13 = vpop.eup %1493 }
 0x561   : > { %779 = vadd.xlane.f32.xlu0 %v778_v12  ;;  %v890_v14 = vsel %vm771_vm5, %v1494_v13, 0.0  ;;  %v1484_v12 = vld [vmem:[%s1795_s13 + $0x38] sm:$0xff]  }
 0x565   : > { %891 = vadd.xlane.f32.xlu0 %v890_v14 }
 0x57b   : > { %896 = vrot.lane.b32.xlu0 %v714_v47, %s1519_s25 }
 0x5ee   : > { %v780_v15 = vpop.xlane.xlu0 %779 }
 0x5ef   : > { %1495 = vrcp.f32 %v780_v15 }
 0x5f2   : > { %v892_v16 = vpop.xlane.xlu0 %891 }
 0x5f3   : > { %1497 = vrcp.f32 %v892_v16 }
 0x5f6   : > { %v897_v20 = vpop.permute.xlu0 %896 }
 0x5f7   : > { %v902_v23 = vsel %vm789_vm6, %v897_v20, 0 }
 0x5f9   : > { %v1496_v18 = vpop.eup %1495 }
 0x5fa   : > { %v782_v19 = vmul.f32 %v1496_v18, %v1492_v11  ;;  %v1483_v11 = vld [vmem:[%s1795_s13 + $0x30] sm:$0xff]  }
 0x5fc   : > { %v783_v21 = vpack.c.bf16 %v782_v19, %v782_v19 }
 0x5fd   : > { %v1498_v22 = vpop.eup %1497 }
 0x5fe   : > { %1404 = vmatmul.mubr.msk.bf16.vlgmr.msra.gmra.mrb[8].mxu0 %vm771_vm5, %v783_v21  ;;  %v894_v24 = vmul.f32 %v1498_v22, %v1494_v13  ;;  %v1346_v13 = vld [vmem:[%s1794_s12] ss:$0 sm:$0xff] }
 0x5ff   : > { %1414 = vmatpush3.bf16.msra.mxu0 %v902_v23  ;;  %1415 = vmatprep.mubr.msk.bf16.mxu0 %vm1514_vm1, %v1513_v25 }
 0x600   : > { %1427 = vmatprep.subr.bf16.mxu0 %v1513_v25  ;;  %v895_v26 = vpack.c.bf16 %v894_v24, %v894_v24 }
 0x606   : > { %1416 = vmatmul.mubr.msk.bf16.vlgmr.msra.gmra.mrb[12].mxu0 %vm771_vm5, %v895_v26 }
 0x607   : > { %1431 = vmatprep.mubr.msk.bf16.mxu0 %vm1514_vm1, %v1513_v25  ;;  %1428 = vmatpush3.bf16.msra.mxu0 %v1475_v53 }
 0x608   : > { %1429 = vmatprep.subr.bf16.mxu0 %v1513_v25 }
 0x6d1   : > { %v827_v29 = vpop.f32.mrb[8].mxu0 }
 0x6d2   : > { %833 = vst.msk [vmem:[#allocation2] sm:$0xff] %vm724_vm4, %v827_v29  ;;  %v1405_v30 = vpop.f32.mrb[9].mxu0 }
 0x6d3   : > { %v830_v31 = vpop.f32.mrb[10].mxu0  ;;  %v1350_v30 = vld [vmem:[%s1796_s14] ss:$0 sm:$0xff] }
 0x6d4   : > { %v1406_v32 = vpop.f32.mrb[11].mxu0 }
 0x6d9   : > { %v938_v33 = vpop.f32.mrb[12].mxu0 }
 0x6da   : > { %945 = vrot.lane.b32.xlu1 %v938_v33, %s1520_s21  ;;  %v1417_v34 = vpop.f32.mrb[13].mxu0 }
 0x6db   : > { %v941_v35 = vpop.f32.mrb[14].mxu0 }
 0x6dc   : > { %v1418_v36 = vpop.f32.mrb[15].mxu0 }
 0x74c   : > { %v946_v37 = vpop.permute.xlu1 %945 }
 0x74d   : > { %949 = vst.msk [vmem:[#allocation2] sm:$0xff] %vm948_vm7, %v946_v37 }
 0x754   : > { %v950_v38 = vld [vmem:[#allocation2] sm:$0xff] }
 0x755   : > { %v951_v39 = vpack.c.bf16 %v950_v38, %v950_v38 }
 0x757   : > { %1424 = vmatmul.mubr.msk.bf16.vlgmr.msra.gmra.mrb[4].mxu1 %vm579_vm0, %v951_v39 }
 0x758   : > { %1451 = vmatprep.mubr.msk.bf16.mxu1 %vm1514_vm1, %v1513_v25  ;;  %1436 = vmatpush3.bf16.msra.mxu1 %v1477_v54 }
 0x759   : > { %1437 = vmatprep.subr.bf16.mxu1 %v1513_v25 }
 0x75c   : > { %1438 = vmatpush3.bf16.msra.mxu1 %v1478_v6 }
 0x75d   : > { %1439 = vmatprep.subr.bf16.mxu1 %v1513_v25 }
 0x760   : > { %1440 = vmatpush3.bf16.msra.mxu1 %v1479_v7 }
 0x761   : > { %1441 = vmatprep.subr.bf16.mxu1 %v1513_v25 }
 0x764   : > { %1442 = vmatpush3.bf16.msra.mxu1 %v1480_v8 }
 0x765   : > { %1443 = vmatprep.subr.bf16.mxu1 %v1513_v25 }
 0x768   : > { %1444 = vmatpush3.bf16.msra.mxu1 %v1481_v9 }
 0x769   : > { %1445 = vmatprep.subr.bf16.mxu1 %v1513_v25 }
 0x76c   : > { %1446 = vmatpush3.bf16.msra.mxu1 %v1482_v10 }
 0x76d   : > { %1447 = vmatprep.subr.bf16.mxu1 %v1513_v25 }
 0x770   : > { %1448 = vmatpush3.bf16.msra.mxu1 %v1483_v11 }
 0x771   : > { %1449 = vmatprep.subr.bf16.mxu1 %v1513_v25 }
 0x774   : > { %1450 = vmatpush3.bf16.msra.mxu1 %v1484_v12 }
 0x82a   : > { %v1012_v41 = vpop.f32.mrb[4].mxu1 }
 0x82b   : > { %v1013_v42 = vadd.f32 %v1340_v40, %v1012_v41  ;;  %v1425_v43 = vpop.f32.mrb[5].mxu1 }
 0x82c   : > { %v1015_v44 = vpop.f32.mrb[6].mxu1 }
 0x82d   : > { %v1716_v45 = vadd.f32 %v1013_v42, %v1640_v17  ;;  %v1426_v46 = vpop.f32.mrb[7].mxu1  ;;  %v1476_v17 = vld [vmem:[%s1793_s11 + $0x8] sm:$0xff]  }
 0x82e   : > { %1430 = vmatpush3.bf16.msra.mxu0 %v1476_v17 }
 0x82f   : > { %v1021_v47 = vsel %vm579_vm0, %v1716_v45, 0.0 }
 0x830   : > { %1022 = vadd.xlane.f32.xlu1 %v1021_v47 }
 0x8bd   : > { %v1023_v48 = vpop.xlane.xlu1 %1022 }
 0x8be   : > { %v1024_v49 = vmul.f32 0.03125, %v1023_v48 }
 0x8c0   : > { %v1025_v50 = vsub.f32 %v1716_v45, %v1024_v49 }
 0x8c2   : > { %v1026_v51 = vmul.f32 %v1025_v50, %v1025_v50 }
 0x8c4   : > { %v1027_v52 = vsel %vm579_vm0, %v1026_v51, 0.0 }
 0x8c5   : > { %1028 = vadd.xlane.f32.xlu0 %v1027_v52 }
 0x952   : > { %v1029_v55 = vpop.xlane.xlu0 %1028 }
 0x953   : > { %v1030_v56 = vmul.f32 0.032258064, %v1029_v55 }
 0x955   : > { %1499 = vrsqrt.f32 %v1030_v56  ;;  %vm1033_vm8 = vcmp.eq.f32.partialorder %v1030_v56, inf  ;;  %v1036_v59 = vand.u32 2147483648, %v1030_v56  ;;  %vm1035_vm9 = vcmp.eq.f32.partialorder %v1030_v56, 0.0 }
 0x95f   : > { %v1500_v57 = vpop.eup %1499 }
 0x960   : > { %v1032_v58 = vmul.f32 %v1500_v57, %v1030_v56 }
 0x962   : > { %v1034_v60 = vsel %vm1033_vm8, %v1030_v56, %v1032_v58 }
 0x963   : > { %v1037_v61 = vsel %vm1035_vm9, %v1036_v59, %v1034_v60 }
 0x964   : > { %v1038_v62 = vadd.f32 1e-06, %v1037_v61 }
 0x966   : > { %1501 = vrcp.f32 %v1038_v62 }
 0x970   : > { %v1502_v63 = vpop.eup %1501 }
 0x971   : > { %v1040_v1 = vmul.f32 %v1502_v63, %v1025_v50 }
 0x973   : > { %v1047_v3 = vmul.f32 %v1344_v0, %v1040_v1 }
 0x975   : > { %v1054_v4 = vadd.f32 %v1345_v2, %v1047_v3 }
 0x977   : > { %v1055_v5 = vpack.c.bf16 %v1054_v4, %v1054_v4 }
 0x979   : > { %1432 = vmatmul.mubr.msk.bf16.vlgmr.msra.gmra.mrb[16].mxu0 %vm579_vm0, %v1055_v5 }
 0xa4c   : > { %v1116_v14 = vpop.f32.mrb[16].mxu0 }
 0xa4d   : > { %v1117_v15 = vadd.f32 %v1346_v13, %v1116_v14  ;;  %v1433_v16 = vpop.f32.mrb[17].mxu0 }
 0xa4e   : > { %v1119_v18 = vpop.f32.mrb[18].mxu0 }
 0xa4f   : > { %v1123_v19 = vmul.f32 %v1117_v15, %v1117_v15  ;;  %v1434_v20 = vpop.f32.mrb[19].mxu0  ;;  %v1122_v27 = vmul.f32 0.5, %v1117_v15 }
 0xa51   : > { %v1124_v21 = vmul.f32 %v1123_v19, %v1117_v15 }
 0xa53   : > { %v1125_v22 = vmul.f32 0.044715, %v1124_v21 }
 0xa55   : > { %v1126_v23 = vadd.f32 %v1125_v22, %v1117_v15 }
 0xa57   : > { %v1127_v24 = vmul.f32 0.7978846, %v1126_v23 }
 0xa59   : > { %1503 = vtanh.f32 %v1127_v24 }
 0xa63   : > { %v1504_v26 = vpop.eup %1503 }
 0xa64   : > { %v1129_v25 = vadd.f32 1.0, %v1504_v26 }
 0xa66   : > { %v1130_v28 = vmul.f32 %v1129_v25, %v1122_v27 }
 0xa68   : > { %v1131_v29 = vpack.c.bf16 %v1130_v28, %v1130_v28 }
 0xa6a   : > { %1452 = vmatmul.mubr.bf16.vlgmr.msra.gmra.mrb[8].mxu1 %v1131_v29 }
 0xb3d   : > { %v1237_v31 = vpop.f32.mrb[8].mxu1 }
 0xb3e   : > { %v1238_v32 = vadd.f32 %v1350_v30, %v1237_v31  ;;  %v1453_v33 = vpop.f32.mrb[9].mxu1 }
 0xb3f   : > { %v1240_v34 = vpop.f32.mrb[10].mxu1 }
 0xb40   : > { %v1243_v35 = vadd.f32 %v1238_v32, %v1716_v45  ;;  %v1454_v36 = vpop.f32.mrb[11].mxu1 }
 0xb42   : > { %1244 = vst.msk [vmem:[%s574_s30] sm:$0xff] %vm579_vm0, %v1243_v35 }
 0xb43 PF: > { %s27_s24 = sadd.s32 1, %s1511_s24  }
 0xb44   : > { %p24_p4 = scmp.ge.s32.totalorder %s27_s24, 4  }
 0xb46   :  { %26 = sbr.rel (!%p24_p4) target bundleno = 3 (0x3), region = 124 }

</bundles_post_ra>
